<compile_context>
chip_gen: v7x
topology: tpu7x:2x2x1
jax: 0.10.0
libtpu: 0.0.40
codegen_flags: <defaults>
</compile_context>

<pallas_src>
import jax
import jax.numpy as jnp
from jax.experimental import pallas as pl
from jax.experimental.pallas import tpu as pltpu


def _round_up(x, m):
    return ((x + m - 1) // m) * m


def _make_supcon_kernel(*, has_mask, inv_temp, loss_scale, n_total, n_pad, tile):
    """Builds the tiled SupCon kernel body (contrast_mode='all')."""
    padded_cols = n_pad > n_total
    tm = tn = tile

    def kernel(*args):
        if has_mask:
            (frow_ref, fcol_ref, mask_ref, out_ref,
             fscaled, m_sc, l_sc, s_sc, c_sc) = args
        else:
            (frow_ref, fcol_ref, rowk_ref, colk_ref, out_ref,
             fscaled, m_sc, l_sc, s_sc, c_sc) = args

        i = pl.program_id(0)
        j = pl.program_id(1)
        nj = pl.num_programs(1)

        @pl.when(j == 0)
        def _init():
            # Fold 1/temperature into the row tile once per row tile
            # (tile*D multiplies instead of an N*N divide on the scores).
            fscaled[...] = frow_ref[...] * inv_temp
            m_sc[...] = jnp.full_like(m_sc, -jnp.inf)
            l_sc[...] = jnp.zeros_like(l_sc)
            s_sc[...] = jnp.zeros_like(s_sc)
            c_sc[...] = jnp.zeros_like(c_sc)

        # scores[a, b] = <f_a / T, f_b>; contract on D directly (no transpose),
        # f32 accumulation on the MXU.
        scores = jax.lax.dot_general(
            fscaled[...], fcol_ref[...],
            dimension_numbers=(((1,), (1,)), ((), ())),
            preferred_element_type=jnp.float32)

        # logits_mask: remove self-contrast (global diagonal) + padded columns.
        local_r = jax.lax.broadcasted_iota(jnp.int32, (tm, tn), 0)
        local_c = jax.lax.broadcasted_iota(jnp.int32, (tm, tn), 1)
        # With square tiles the global diagonal only appears when i == j.
        not_self = jnp.logical_or(i != j, local_r != local_c)
        if padded_cols:
            col_ok = (j * tn + local_c) < n_total
            lmask = jnp.logical_and(not_self, col_ok)
        else:
            lmask = not_self
        lmask_f = lmask.astype(jnp.float32)

        # Positive-pair mask for this tile.
        if has_mask:
            mask_f = mask_ref[...].astype(jnp.float32) * lmask_f
        else:
            pos = rowk_ref[...] == colk_ref[...]   # (tm,1)==(1,tn) -> (tm,tn)
            mask_f = jnp.logical_and(pos, lmask).astype(jnp.float32)

        # Online log-sum-exp of the masked denominator (global per-row max).
        m_prev = m_sc[...]
        m_new = jnp.maximum(m_prev, jnp.max(scores, axis=1, keepdims=True))
        alpha = jnp.exp(m_prev - m_new)
        p = jnp.exp(scores - m_new) * lmask_f
        l_sc[...] = alpha * l_sc[...] + jnp.sum(p, axis=1, keepdims=True)
        m_sc[...] = m_new

        # Positive-pair accumulators (the row-max cancels in log_prob, so the
        # raw scaled logits are sufficient).
        s_sc[...] += jnp.sum(mask_f * scores, axis=1, keepdims=True)
        c_sc[...] += jnp.sum(mask_f, axis=1, keepdims=True)

        @pl.when(j == nj - 1)
        def _finalize():
            lse = m_sc[...] + jnp.log(l_sc[...])
            # sum_pos(log_prob)/count == sum_pos(score)/count - lse
            # (count == 0 -> NaN, matching the PyTorch reference behaviour).
            mean_log_prob_pos = s_sc[...] / c_sc[...] - lse
            out_ref[...] = (-loss_scale) * mean_log_prob_pos

    return kernel


def supcon_loss(features, labels=None, mask=None, *, temperature=0.07,
                contrast_mode='all', base_temperature=0.07, block=256):
    """JAX/Pallas equivalent of SupConLoss.forward (contrast_mode='all')."""
    features = jnp.asarray(features)
    if features.ndim < 3:
        raise ValueError('`features` needs to be [bsz, n_views, ...], '
                         'at least 3 dimensions are required')
    if features.ndim > 3:
        features = features.reshape(features.shape[0], features.shape[1], -1)
    bsz, n_views, dim = features.shape

    if contrast_mode == 'one':
        # TODO(synk): contrast_mode='one' uses a rectangular [bsz, N] logits
        # matrix; only the default 'all' mode is implemented in the kernel.
        raise NotImplementedError("contrast_mode='one' not implemented")
    if contrast_mode != 'all':
        raise ValueError('Unknown mode: {}'.format(contrast_mode))
    if labels is not None and mask is not None:
        raise ValueError('Cannot define both `labels` and `mask`')

    n_total = n_views * bsz

    # contrast_feature: [n_views*bsz, dim], view-major (== torch.cat(unbind)).
    cf = jnp.transpose(features, (1, 0, 2)).reshape(n_total, dim)
    # Keep bf16 features in bf16 (full-rate MXU, f32 accumulate); others -> f32.
    if cf.dtype != jnp.bfloat16 and cf.dtype != jnp.float32:
        cf = cf.astype(jnp.float32)

    # Tile / padding geometry: square tiles, multiples of 128 lanes.
    tile = min(_round_up(max(int(block), 128), 128), _round_up(n_total, 128))
    n_pad = _round_up(n_total, tile)
    d_pad = _round_up(dim, 128)
    if n_pad != n_total or d_pad != dim:
        cf = jnp.pad(cf, ((0, n_pad - n_total), (0, d_pad - dim)))

    grid = (n_pad // tile, n_pad // tile)
    kernel_kwargs = dict(
        inv_temp=1.0 / float(temperature),
        loss_scale=float(temperature) / float(base_temperature),
        n_total=n_total, n_pad=n_pad, tile=tile)

    feat_row_spec = pl.BlockSpec((tile, d_pad), lambda i, j: (i, 0))
    feat_col_spec = pl.BlockSpec((tile, d_pad), lambda i, j: (j, 0))

    if mask is not None:
        base_mask = jnp.asarray(mask, dtype=jnp.float32)
        if base_mask.shape != (bsz, bsz):
            raise ValueError('`mask` must have shape [bsz, bsz]')
        tiled_mask = jnp.tile(base_mask, (n_views, n_views))
        if n_pad != n_total:
            tiled_mask = jnp.pad(
                tiled_mask, ((0, n_pad - n_total), (0, n_pad - n_total)))
        operands = (cf, cf, tiled_mask)
        in_specs = [feat_row_spec, feat_col_spec,
                    pl.BlockSpec((tile, tile), lambda i, j: (i, j))]
        kernel = _make_supcon_kernel(has_mask=True, **kernel_kwargs)
    else:
        if labels is None:
            keys = jnp.arange(bsz, dtype=jnp.int32)   # SimCLR: eye(bsz)
        else:
            labels = jnp.asarray(labels).reshape(-1)
            if labels.shape[0] != bsz:
                raise ValueError('Num of labels does not match num of features')
            keys = labels.astype(jnp.int32)
        keys = jnp.tile(keys, (n_views,))             # view-major anchor order
        if n_pad != n_total:
            keys = jnp.pad(keys, (0, n_pad - n_total))
        row_keys = keys.reshape(n_pad, 1)
        col_keys = keys.reshape(1, n_pad)
        operands = (cf, cf, row_keys, col_keys)
        in_specs = [feat_row_spec, feat_col_spec,
                    pl.BlockSpec((tile, 1), lambda i, j: (i, 0)),
                    pl.BlockSpec((1, tile), lambda i, j: (0, j))]
        kernel = _make_supcon_kernel(has_mask=False, **kernel_kwargs)

    per_anchor = pl.pallas_call(
        kernel,
        out_shape=jax.ShapeDtypeStruct((n_pad, 1), jnp.float32),
        grid=grid,
        in_specs=in_specs,
        out_specs=pl.BlockSpec((tile, 1), lambda i, j: (i, 0)),
        scratch_shapes=[
            pltpu.VMEM((tile, d_pad), cf.dtype),   # 1/T-scaled row tile
            pltpu.VMEM((tile, 1), jnp.float32),    # running row max
            pltpu.VMEM((tile, 1), jnp.float32),    # running masked sum-exp
            pltpu.VMEM((tile, 1), jnp.float32),    # running positive-logit sum
            pltpu.VMEM((tile, 1), jnp.float32),    # running positive count
        ],
        compiler_params=pltpu.CompilerParams(
            dimension_semantics=("parallel", "arbitrary"),
            vmem_limit_bytes=48 * 1024 * 1024),
    )(*operands)

    # loss.view(anchor_count, batch_size).mean() == mean over all N anchors;
    # padded rows are dropped before the reduction.
    return jnp.mean(per_anchor[:n_total, 0])


def _supcon_loss_ref(features, labels=None, mask=None,
                     temperature=0.07, base_temperature=0.07):
    """Pure-JAX reference (mirrors the PyTorch module, contrast_mode='all')."""
    bsz, n_views, dim = features.shape
    if labels is None and mask is None:
        base = jnp.eye(bsz, dtype=jnp.float32)
    elif labels is not None:
        l = jnp.asarray(labels).reshape(-1, 1)
        base = (l == l.T).astype(jnp.float32)
    else:
        base = jnp.asarray(mask, dtype=jnp.float32)
    cf = jnp.transpose(features, (1, 0, 2)).reshape(n_views * bsz, dim)
    cf = cf.astype(jnp.float32)
    adc = (cf @ cf.T) / temperature
    logits = adc - jnp.max(adc, axis=1, keepdims=True)
    n = n_views * bsz
    full_mask = jnp.tile(base, (n_views, n_views))
    logits_mask = 1.0 - jnp.eye(n, dtype=jnp.float32)
    full_mask = full_mask * logits_mask
    exp_logits = jnp.exp(logits) * logits_mask
    log_prob = logits - jnp.log(exp_logits.sum(1, keepdims=True))
    mean_log_prob_pos = (full_mask * log_prob).sum(1) / full_mask.sum(1)
    loss = -(temperature / base_temperature) * mean_log_prob_pos
    return loss.reshape(n_views, bsz).mean()


if __name__ == "__main__":
    key = jax.random.PRNGKey(0)
    k1, k2, k3 = jax.random.split(key, 3)

    # 1) Small SimCLR case (labels=None, mask=None): [bsz, n_views, dim].
    bsz, n_views, dim = 8, 2, 32
    feats = jax.random.normal(k1, (bsz, n_views, dim), dtype=jnp.float32)
    feats = feats / jnp.linalg.norm(feats, axis=-1, keepdims=True)
    loss = jax.block_until_ready(supcon_loss(feats))
    ref = _supcon_loss_ref(feats)
    assert jnp.allclose(loss, ref, rtol=1e-4, atol=1e-4), (loss, ref)

    # 2) Supervised (labels) case exercising multi-tile grid + padding
    #    (N=160 -> padded to 256 with tile=128; D=40 -> padded to 128).
    bsz2, n_views2, dim2 = 80, 2, 40
    feats2 = jax.random.normal(k2, (bsz2, n_views2, dim2), dtype=jnp.float32)
    feats2 = feats2 / jnp.linalg.norm(feats2, axis=-1, keepdims=True)
    labels2 = jax.random.randint(k3, (bsz2,), 0, 10)
    loss2 = jax.block_until_ready(supcon_loss(feats2, labels=labels2, block=128))
    ref2 = _supcon_loss_ref(feats2, labels=labels2)
    assert jnp.allclose(loss2, ref2, rtol=1e-4, atol=1e-4), (loss2, ref2)

    # 3) Explicit-mask path (tiled [N,N] mask input) must agree with (2).
    mask2 = (labels2[:, None] == labels2[None, :]).astype(jnp.float32)
    loss3 = jax.block_until_ready(supcon_loss(feats2, mask=mask2, block=128))
    assert jnp.allclose(loss3, ref2, rtol=1e-4, atol=1e-4), (loss3, ref2)

    print("KERNEL_OK")
</pallas_src>

<mosaic_0001>
module attributes {stable_mosaic.version = 11 : i64} {
  func.func @kernel(%arg0: i32, %arg1: i32, %arg2: memref<128x128xf32, #tpu.memory_space<vmem>>, %arg3: memref<128x128xf32, #tpu.memory_space<vmem>>, %arg4: memref<128x1xi32, #tpu.memory_space<vmem>>, %arg5: memref<1x128xi32, #tpu.memory_space<vmem>>, %arg6: memref<128x1xf32, #tpu.memory_space<vmem>>, %arg7: memref<128x128xf32, #tpu.memory_space<vmem>>, %arg8: memref<128x1xf32, #tpu.memory_space<vmem>>, %arg9: memref<128x1xf32, #tpu.memory_space<vmem>>, %arg10: memref<128x1xf32, #tpu.memory_space<vmem>>, %arg11: memref<128x1xf32, #tpu.memory_space<vmem>>) attributes {dimension_semantics = [#tpu.dimension_semantics<parallel>, #tpu.dimension_semantics<arbitrary>], iteration_bounds = array<i64: 1, 1>, scalar_prefetch = 0 : i64, scratch_operands = 5 : i64, tpu.core_type = #tpu.core_type<tc>, window_params = [{transform_indices = @transform_0, window_bounds = array<i64: 128, 128>}, {transform_indices = @transform_1, window_bounds = array<i64: 128, 128>}, {transform_indices = @transform_2, window_bounds = array<i64: 128, 1>}, {transform_indices = @transform_3, window_bounds = array<i64: 1, 128>}, {transform_indices = @transform_4, window_bounds = array<i64: 128, 1>}]} {
    %c0_i32 = arith.constant 0 : i32
    %0 = arith.cmpi eq, %arg1, %c0_i32 : i32
    %1 = arith.extui %0 : i1 to i32
    %c0_i32_0 = arith.constant 0 : i32
    %2 = arith.cmpi ne, %1, %c0_i32_0 : i32
    scf.if %2 {
      %c0_30 = arith.constant 0 : index
      %c0_31 = arith.constant 0 : index
      %59 = vector.load %arg2[%c0_30, %c0_31] : memref<128x128xf32, #tpu.memory_space<vmem>>, vector<128x128xf32>
      %cst_32 = arith.constant 14.2857141 : f32
      %60 = vector.broadcast %cst_32 : f32 to vector<128x128xf32>
      %61 = arith.mulf %59, %60 : vector<128x128xf32>
      %c0_33 = arith.constant 0 : index
      %c0_34 = arith.constant 0 : index
      %62 = vector.load %arg7[%c0_33, %c0_34] : memref<128x128xf32, #tpu.memory_space<vmem>>, vector<128x128xf32>
      tpu.vector_store %arg7[%c0_33, %c0_34], %61 {strides = array<i32>} : memref<128x128xf32, #tpu.memory_space<vmem>>, vector<128x128xf32>,
      %cst_35 = arith.constant 0xFF800000 : f32
      %63 = vector.broadcast %cst_35 : f32 to vector<128x1xf32>
      %c0_36 = arith.constant 0 : index
      %c0_37 = arith.constant 0 : index
      %64 = vector.load %arg8[%c0_36, %c0_37] : memref<128x1xf32, #tpu.memory_space<vmem>>, vector<128x1xf32>
      tpu.vector_store %arg8[%c0_36, %c0_37], %63 {strides = array<i32>} : memref<128x1xf32, #tpu.memory_space<vmem>>, vector<128x1xf32>,
      %cst_38 = arith.constant 0.000000e+00 : f32
      %65 = vector.broadcast %cst_38 : f32 to vector<128x1xf32>
      %c0_39 = arith.constant 0 : index
      %c0_40 = arith.constant 0 : index
      %66 = vector.load %arg9[%c0_39, %c0_40] : memref<128x1xf32, #tpu.memory_space<vmem>>, vector<128x1xf32>
      tpu.vector_store %arg9[%c0_39, %c0_40], %65 {strides = array<i32>} : memref<128x1xf32, #tpu.memory_space<vmem>>, vector<128x1xf32>,
      %cst_41 = arith.constant 0.000000e+00 : f32
      %67 = vector.broadcast %cst_41 : f32 to vector<128x1xf32>
      %c0_42 = arith.constant 0 : index
      %c0_43 = arith.constant 0 : index
      %68 = vector.load %arg10[%c0_42, %c0_43] : memref<128x1xf32, #tpu.memory_space<vmem>>, vector<128x1xf32>
      tpu.vector_store %arg10[%c0_42, %c0_43], %67 {strides = array<i32>} : memref<128x1xf32, #tpu.memory_space<vmem>>, vector<128x1xf32>,
      %cst_44 = arith.constant 0.000000e+00 : f32
      %69 = vector.broadcast %cst_44 : f32 to vector<128x1xf32>
      %c0_45 = arith.constant 0 : index
      %c0_46 = arith.constant 0 : index
      %70 = vector.load %arg11[%c0_45, %c0_46] : memref<128x1xf32, #tpu.memory_space<vmem>>, vector<128x1xf32>
      tpu.vector_store %arg11[%c0_45, %c0_46], %69 {strides = array<i32>} : memref<128x1xf32, #tpu.memory_space<vmem>>, vector<128x1xf32>,
    } else {
    }
    %c0 = arith.constant 0 : index
    %c0_1 = arith.constant 0 : index
    %3 = vector.load %arg7[%c0, %c0_1] : memref<128x128xf32, #tpu.memory_space<vmem>>, vector<128x128xf32>
    %c0_2 = arith.constant 0 : index
    %c0_3 = arith.constant 0 : index
    %4 = vector.load %arg3[%c0_2, %c0_3] : memref<128x128xf32, #tpu.memory_space<vmem>>, vector<128x128xf32>
    %cst = arith.constant dense<0.000000e+00> : vector<128x128xf32>
    %5 = tpu.matmul %3, %4, %cst {dimension_numbers = #tpu.dot_dimension_numbers<[1], [1], [0], [0], [0, 0, 1, 0], [], []>} : vector<128x128xf32>, vector<128x128xf32>, vector<128x128xf32> -> vector<128x128xf32>
    %6 = tpu.iota {dimensions = array<i32: 0>} : vector<128x128xi32>
    %7 = tpu.iota {dimensions = array<i32: 1>} : vector<128x128xi32>
    %8 = arith.cmpi ne, %arg0, %arg1 : i32
    %9 = arith.cmpi ne, %6, %7 : vector<128x128xi32>
    %10 = vector.broadcast %8 : i1 to vector<128x128xi1>
    %11 = arith.ori %10, %9 : vector<128x128xi1>
    %c128_i32 = arith.constant 128 : i32
    %12 = arith.muli %arg1, %c128_i32 : i32
    %13 = vector.broadcast %12 : i32 to vector<128x128xi32>
    %14 = arith.addi %13, %7 : vector<128x128xi32>
    %c16_i32 = arith.constant 16 : i32
    %15 = vector.broadcast %c16_i32 : i32 to vector<128x128xi32>
    %16 = arith.cmpi slt, %14, %15 : vector<128x128xi32>
    %17 = arith.andi %11, %16 : vector<128x128xi1>
    %18 = arith.extui %17 : vector<128x128xi1> to vector<128x128xi32>
    %19 = arith.sitofp %18 : vector<128x128xi32> to vector<128x128xf32>
    %c0_4 = arith.constant 0 : index
    %c0_5 = arith.constant 0 : index
    %20 = vector.load %arg4[%c0_4, %c0_5] : memref<128x1xi32, #tpu.memory_space<vmem>>, vector<128x1xi32>
    %c0_6 = arith.constant 0 : index
    %c0_7 = arith.constant 0 : index
    %21 = vector.load %arg5[%c0_6, %c0_7] : memref<1x128xi32, #tpu.memory_space<vmem>>, vector<1x128xi32>
    %22 = vector.broadcast %20 : vector<128x1xi32> to vector<128x128xi32>
    %23 = vector.broadcast %21 : vector<1x128xi32> to vector<128x128xi32>
    %24 = arith.cmpi eq, %22, %23 : vector<128x128xi32>
    %25 = arith.andi %24, %17 : vector<128x128xi1>
    %26 = arith.extui %25 : vector<128x128xi1> to vector<128x128xi32>
    %27 = arith.sitofp %26 : vector<128x128xi32> to vector<128x128xf32>
    %c0_8 = arith.constant 0 : index
    %c0_9 = arith.constant 0 : index
    %28 = vector.load %arg8[%c0_8, %c0_9] : memref<128x1xf32, #tpu.memory_space<vmem>>, vector<128x1xf32>
    %cst_10 = arith.constant dense<0xFF800000> : vector<128xf32>
    %29 = vector.multi_reduction <maximumf>, %5, %cst_10 [1] : vector<128x128xf32> to vector<128xf32>
    %30 = vector.shape_cast %29 : vector<128xf32> to vector<128x1xf32>
    %31 = arith.maximumf %28, %30 : vector<128x1xf32>
    %32 = arith.subf %28, %31 : vector<128x1xf32>
    %33 = math.exp %32 : vector<128x1xf32>
    %34 = vector.broadcast %31 : vector<128x1xf32> to vector<128x128xf32>
    %35 = arith.subf %5, %34 : vector<128x128xf32>
    %36 = math.exp %35 : vector<128x128xf32>
    %37 = arith.mulf %36, %19 : vector<128x128xf32>
    %c0_11 = arith.constant 0 : index
    %c0_12 = arith.constant 0 : index
    %38 = vector.load %arg9[%c0_11, %c0_12] : memref<128x1xf32, #tpu.memory_space<vmem>>, vector<128x1xf32>
    %39 = arith.mulf %33, %38 : vector<128x1xf32>
    %cst_13 = arith.constant dense<0.000000e+00> : vector<128xf32>
    %40 = vector.multi_reduction <add>, %37, %cst_13 [1] : vector<128x128xf32> to vector<128xf32>
    %41 = vector.shape_cast %40 : vector<128xf32> to vector<128x1xf32>
    %42 = arith.addf %39, %41 : vector<128x1xf32>
    %c0_14 = arith.constant 0 : index
    %c0_15 = arith.constant 0 : index
    %43 = vector.load %arg9[%c0_14, %c0_15] : memref<128x1xf32, #tpu.memory_space<vmem>>, vector<128x1xf32>
    tpu.vector_store %arg9[%c0_14, %c0_15], %42 {strides = array<i32>} : memref<128x1xf32, #tpu.memory_space<vmem>>, vector<128x1xf32>,
    %c0_16 = arith.constant 0 : index
    %c0_17 = arith.constant 0 : index
    %44 = vector.load %arg8[%c0_16, %c0_17] : memref<128x1xf32, #tpu.memory_space<vmem>>, vector<128x1xf32>
    tpu.vector_store %arg8[%c0_16, %c0_17], %31 {strides = array<i32>} : memref<128x1xf32, #tpu.memory_space<vmem>>, vector<128x1xf32>,
    %c0_18 = arith.constant 0 : index
    %c0_19 = arith.constant 0 : index
    %45 = vector.load %arg10[%c0_18, %c0_19] : memref<128x1xf32, #tpu.memory_space<vmem>>, vector<128x1xf32>
    %46 = arith.mulf %27, %5 : vector<128x128xf32>
    %cst_20 = arith.constant dense<0.000000e+00> : vector<128xf32>
    %47 = vector.multi_reduction <add>, %46, %cst_20 [1] : vector<128x128xf32> to vector<128xf32>
    %48 = vector.shape_cast %47 : vector<128xf32> to vector<128x1xf32>
    %49 = arith.addf %45, %48 : vector<128x1xf32>
    %c0_21 = arith.constant 0 : index
    %c0_22 = arith.constant 0 : index
    %50 = vector.load %arg10[%c0_21, %c0_22] : memref<128x1xf32, #tpu.memory_space<vmem>>, vector<128x1xf32>
    tpu.vector_store %arg10[%c0_21, %c0_22], %49 {strides = array<i32>} : memref<128x1xf32, #tpu.memory_space<vmem>>, vector<128x1xf32>,
    %c0_23 = arith.constant 0 : index
    %c0_24 = arith.constant 0 : index
    %51 = vector.load %arg11[%c0_23, %c0_24] : memref<128x1xf32, #tpu.memory_space<vmem>>, vector<128x1xf32>
    %cst_25 = arith.constant dense<0.000000e+00> : vector<128xf32>
    %52 = vector.multi_reduction <add>, %27, %cst_25 [1] : vector<128x128xf32> to vector<128xf32>
    %53 = vector.shape_cast %52 : vector<128xf32> to vector<128x1xf32>
    %54 = arith.addf %51, %53 : vector<128x1xf32>
    %c0_26 = arith.constant 0 : index
    %c0_27 = arith.constant 0 : index
    %55 = vector.load %arg11[%c0_26, %c0_27] : memref<128x1xf32, #tpu.memory_space<vmem>>, vector<128x1xf32>
    tpu.vector_store %arg11[%c0_26, %c0_27], %54 {strides = array<i32>} : memref<128x1xf32, #tpu.memory_space<vmem>>, vector<128x1xf32>,
    %c0_i32_28 = arith.constant 0 : i32
    %56 = arith.cmpi eq, %arg1, %c0_i32_28 : i32
    %57 = arith.extui %56 : i1 to i32
    %c0_i32_29 = arith.constant 0 : i32
    %58 = arith.cmpi ne, %57, %c0_i32_29 : i32
    scf.if %58 {
      %c0_30 = arith.constant 0 : index
      %c0_31 = arith.constant 0 : index
      %59 = vector.load %arg8[%c0_30, %c0_31] : memref<128x1xf32, #tpu.memory_space<vmem>>, vector<128x1xf32>
      %c0_32 = arith.constant 0 : index
      %c0_33 = arith.constant 0 : index
      %60 = vector.load %arg9[%c0_32, %c0_33] : memref<128x1xf32, #tpu.memory_space<vmem>>, vector<128x1xf32>
      %61 = math.log %60 : vector<128x1xf32>
      %62 = arith.addf %59, %61 : vector<128x1xf32>
      %c0_34 = arith.constant 0 : index
      %c0_35 = arith.constant 0 : index
      %63 = vector.load %arg10[%c0_34, %c0_35] : memref<128x1xf32, #tpu.memory_space<vmem>>, vector<128x1xf32>
      %c0_36 = arith.constant 0 : index
      %c0_37 = arith.constant 0 : index
      %64 = vector.load %arg11[%c0_36, %c0_37] : memref<128x1xf32, #tpu.memory_space<vmem>>, vector<128x1xf32>
      %65 = arith.divf %63, %64 : vector<128x1xf32>
      %66 = arith.subf %65, %62 : vector<128x1xf32>
      %cst_38 = arith.constant -1.000000e+00 : f32
      %67 = vector.broadcast %cst_38 : f32 to vector<128x1xf32>
      %68 = arith.mulf %67, %66 : vector<128x1xf32>
      %c0_39 = arith.constant 0 : index
      %c0_40 = arith.constant 0 : index
      %69 = vector.load %arg6[%c0_39, %c0_40] : memref<128x1xf32, #tpu.memory_space<vmem>>, vector<128x1xf32>
      tpu.vector_store %arg6[%c0_39, %c0_40], %68 {strides = array<i32>} : memref<128x1xf32, #tpu.memory_space<vmem>>, vector<128x1xf32>,
    } else {
    }
    return
  }
  func.func @transform_0(%arg0: i32, %arg1: i32) -> (i32, i32) {
    %c0_i32 = arith.constant 0 : i32
    %c0_i32_0 = arith.constant 0 : i32
    return %arg0, %c0_i32 : i32, i32
  }
  func.func @transform_1(%arg0: i32, %arg1: i32) -> (i32, i32) {
    %c0_i32 = arith.constant 0 : i32
    %c0_i32_0 = arith.constant 0 : i32
    return %arg1, %c0_i32 : i32, i32
  }
  func.func @transform_2(%arg0: i32, %arg1: i32) -> (i32, i32) {
    %c0_i32 = arith.constant 0 : i32
    %c0_i32_0 = arith.constant 0 : i32
    return %arg0, %c0_i32 : i32, i32
  }
  func.func @transform_3(%arg0: i32, %arg1: i32) -> (i32, i32) {
    %c0_i32 = arith.constant 0 : i32
    %c0_i32_0 = arith.constant 0 : i32
    return %c0_i32, %arg1 : i32, i32
  }
  func.func @transform_4(%arg0: i32, %arg1: i32) -> (i32, i32) {
    %c0_i32 = arith.constant 0 : i32
    %c0_i32_0 = arith.constant 0 : i32
    return %arg0, %c0_i32 : i32, i32
  }
}

</mosaic_0001>

<bundles_post_ra>
// kernel: tpu_custom_call.1
= control target key start
LH: loop header
LB: loop body
LE: loop exit
PB: predicated region body
PF: predicated region fallthrough
CT: control target
= control target key end

     0   :  { %9 = vsyncpa [#allocation8], 0  ;;  %s1639_s15 = smov [#allocation7]   ;;  %s2612_s0 = inlined_call_operand.vmem [shape: f32[128,128], index: 0, kind: input, shape index: {}]   ;;  %s2613_s1 = inlined_call_operand.hbm [shape: f32[128,128], index: 1, kind: input, shape index: {}]   ;;  %s2614_s2 = inlined_call_operand.vmem [shape: s32[128,1], index: 2, kind: input, shape index: {}]   ;;  %s2615_s3 = inlined_call_operand.vmem [shape: s32[1,128], index: 3, kind: input, shape index: {}]   ;;  %s2616_s4 = inlined_call_operand.vmem [shape: f32[128,1], index: 4, kind: output, shape index: {}]  }
   0x1   :  { %s17_s16 = sshll.u32 %s1639_s15, 4  ;;  %s1615_s19 = scalar_lea.hbm %s2613_s1, 2048  ;;  %s18_s16 = int_to_ptr.vmem [resolvable:$true] %s17_s16 }
   0x2   :  { %p1616_p0 = scmp.ne.s32.totalorder %s2613_s1, %s1615_s19  ;;  %p1619_p1 = scmp.lt.u32.totalorder %s1615_s19, %s2613_s1 }
   0x4   :  { %p1621_p2 = pnand %p1619_p1, %p1616_p0 }
   0x6   :  { %1624 = shalt.err (!%p1621_p2)
}
   0x7   :  { %s1625_s24 = scalar_lea.vmem %s18_s16, 2048  ;;  %p1630_p4 = scmp.lt.s32.totalorder %s18_s16, %s18_s16 }
   0x8   :  { %p1626_p3 = scmp.ne.s32.totalorder %s18_s16, %s1625_s24  ;;  %p1631_p5 = scmp.lt.s32.totalorder %s1625_s24, %s1625_s24 }
   0xa   :  { %p1632_p6 = por %p1631_p5, %p1630_p4 }
   0xc   :  { %p1633_p7 = pnand %p1632_p6, %p1626_p3 }
   0xe   :  { %1636 = shalt.err (!%p1633_p7)
}
   0xf   :  { %s1640_s25 = smov 128   ;;  %s1641_s26 = smov 8  }
  0x10   :  { %23 = dma.hbm_to_vmem [thread:$0]  %s2613_s1, 2048, %s18_s16, [#allocation8], %s1640_s25, %s1640_s25, %s1641_s26  }
  0x11   :  { %1637 = dma.done.wait [#allocation8], 2048  }
  0x12   :  { %1638 = vsyncadd [#allocation8], 4294965248  ;;  %v1642_v0 = vmov 0   ;;  %v164_v1 = vld [vmem:[#allocation7] sm:$0xff]  ;;  %v165_v2 = vld [vmem:[#allocation7 + $0x8] sm:$0xff]  ;;  %vm2636_vm13 = vcmask 7168  }
  0x13   :  { %1486 = vset.pattern.permute.xlu1 %v1642_v0  ;;  %1485 = vset.pattern.permute.xlu0 %v1642_v0  ;;  %v166_v3 = vld [vmem:[#allocation7 + $0x10] sm:$0xff]  ;;  %v1431_v4 = vpack.c.bf16 %v165_v2, %v164_v1  ;;  %v167_v5 = vld [vmem:[#allocation7 + $0x18] sm:$0xff]  ;;  %v35_v7 = vld [vmem:[%s2612_s0] sm:$0xff]  ;;  %v325_v2 = vlaneseq }
  0x14   :  { %v1435_v6 = vpack.c.bf16 %v167_v5, %v166_v3  ;;  %v43_v8 = vld [vmem:[%s2612_s0 + $0x40] sm:$0xff]  ;;  %v169_v10 = vld [vmem:[#allocation7 + $0x28] sm:$0xff]  ;;  %v51_v11 = vmul.f32 14.285714, %v35_v7  ;;  %v434_v14 = vld [vmem:[%s2614_s2 + $0x10] sm:$0xff] }
  0x15   :  { %1432 = vmatprep.subr.bf16.mxu0 %v1431_v4  ;;  %1463 = vmatprep.subr.bf16.mxu1 %v1431_v4  ;;  %v168_v9 = vld [vmem:[#allocation7 + $0x20] sm:$0xff]  ;;  %v59_v12 = vmul.f32 14.285714, %v43_v8  ;;  %v170_v15 = vld [vmem:[#allocation7 + $0x30] sm:$0xff]  ;;  %v171_v16 = vld [vmem:[#allocation7 + $0x38] sm:$0xff]  ;;  %v1757_v3 = vshrl.u32 %v325_v2, 7 }
  0x16   :  { %1434 = vmatpush3.bf16.xpose.msra.mxu0 %v1431_v4  ;;  %1471 = vmatpush3.bf16.xpose.msra.mxu1 %v1431_v4  ;;  %v1439_v13 = vpack.c.bf16 %v169_v10, %v168_v9  ;;  %v432_v17 = vld [vmem:[%s2614_s2] sm:$0xff]  ;;  %v435_v18 = vld [vmem:[%s2614_s2 + $0x18] sm:$0xff]  ;;  %v433_v19 = vld [vmem:[%s2614_s2 + $0x8] sm:$0xff]  ;;  %v1443_v20 = vpack.c.bf16 %v171_v16, %v170_v15  ;;  %v1760_v5 = vand.u32 127, %v325_v2  ;;  %v2654_v8 = vmov 0 }
  0x17   :  { %1436 = vmatprep.subr.bf16.mxu0 %v1435_v6  ;;  %1464 = vmatprep.subr.bf16.mxu1 %v1435_v6  ;;  %v437_v21 = vld [vmem:[%s2614_s2 + $0x28] sm:$0xff]  ;;  %v172_v22 = vld [vmem:[#allocation7 + $0x40] sm:$0xff]  ;;  %v439_v24 = vld [vmem:[%s2614_s2 + $0x38] sm:$0xff]  ;;  %v328_v4 = vadd.s32 16, %v1757_v3  ;;  %v2656_v10 = vmov 0 }
  0x18   :  { %1407 = vmatprep.mubr.f32.mxu0 %v51_v11  ;;  %1419 = vmatprep.mubr.f32.mxu1 %v59_v12  ;;  %v173_v23 = vld [vmem:[#allocation7 + $0x48] sm:$0xff]  ;;  %v174_v27 = vld [vmem:[#allocation7 + $0x50] sm:$0xff]  ;;  %v175_v28 = vld [vmem:[#allocation7 + $0x58] sm:$0xff]  ;;  %vm345_vm1 = vcmp.ne.s32.totalorder %v1757_v3, %v1760_v5  ;;  %vm2649_vm2 = vcmp.lt.s32.totalorder %v1760_v5, 16  ;;  %v2617_v12 = vmov 0.0  }
  0x19   :  { %456 = vperm.xlu1 %1486, %v434_v14   ;;  %450 = vperm.xlu0 %1485, %v432_v17   ;;  %v1447_v25 = vpack.c.bf16 %v173_v23, %v172_v22  ;;  %v441_v26 = vld [vmem:[%s2614_s2 + $0x48] sm:$0xff]  ;;  %v443_v29 = vld [vmem:[%s2614_s2 + $0x58] sm:$0xff]  ;;  %v1451_v30 = vpack.c.bf16 %v175_v28, %v174_v27  ;;  %v444_v31 = vld [vmem:[%s2614_s2 + $0x60] sm:$0xff]  ;;  %vm347_vm0 = vcmp.ne.s32.totalorder %v328_v4, %v1760_v5  ;;  %v329_v22 = vadd.s32 24, %v1757_v3 }
  0x1a   :  { %v176_v32 = vld [vmem:[#allocation7 + $0x60] sm:$0xff]  ;;  %v177_v33 = vld [vmem:[#allocation7 + $0x68] sm:$0xff]  ;;  %v178_v35 = vld [vmem:[#allocation7 + $0x70] sm:$0xff]  ;;  %132 = vst.msk [vmem:[#allocation6] sm:$0xff] %vm2636_vm13, %v2617_v12 }
  0x1b   :  { %v1455_v34 = vpack.c.bf16 %v177_v33, %v176_v32  ;;  %v179_v36 = vld [vmem:[#allocation7 + $0x78] sm:$0xff]  ;;  %v36_v38 = vld [vmem:[%s2612_s0 + $0x8] sm:$0xff]  ;;  %v37_v40 = vld [vmem:[%s2612_s0 + $0x10] sm:$0xff]  ;;  %100 = vst.msk [vmem:[#allocation4] sm:$0xff] %vm2636_vm13, %v2617_v12  ;;  %vm348_vm14 = vcmp.ne.s32.totalorder %v329_v22, %v1760_v5  ;;  %v2662_v32 = vmov 0 }
  0x1c   :  { %v1459_v37 = vpack.c.bf16 %v179_v36, %v178_v35  ;;  %v44_v39 = vld [vmem:[%s2612_s0 + $0x48] sm:$0xff]  ;;  %v45_v41 = vld [vmem:[%s2612_s0 + $0x50] sm:$0xff]  ;;  %v52_v42 = vmul.f32 14.285714, %v36_v38  ;;  %v53_v44 = vmul.f32 14.285714, %v37_v40  ;;  %vm1774_vm3 = vmand %vm347_vm0, %vm2649_vm2 }
  0x1d   :  { %459 = vperm.xlu1 %1486, %v435_v18   ;;  %453 = vperm.xlu0 %1485, %v433_v19   ;;  %v60_v43 = vmul.f32 14.285714, %v44_v39  ;;  %v61_v45 = vmul.f32 14.285714, %v45_v41  ;;  %v38_v46 = vld [vmem:[%s2612_s0 + $0x18] sm:$0xff]  ;;  %v39_v48 = vld [vmem:[%s2612_s0 + $0x20] sm:$0xff]  ;;  %vm1780_vm4 = vmand %vm345_vm1, %vm2649_vm2 }
  0x1e   :  { %1438 = vmatpush3.bf16.xpose.msra.mxu0 %v1435_v6  ;;  %1472 = vmatpush3.bf16.xpose.msra.mxu1 %v1435_v6  ;;  %v46_v47 = vld [vmem:[%s2612_s0 + $0x58] sm:$0xff]  ;;  %v47_v49 = vld [vmem:[%s2612_s0 + $0x60] sm:$0xff]  ;;  %v54_v50 = vmul.f32 14.285714, %v38_v46  ;;  %v55_v52 = vmul.f32 14.285714, %v39_v48  ;;  %vm1934_vm0 = vmand %vm348_vm14, %vm2649_vm2 }
  0x1f   :  { %1440 = vmatprep.subr.bf16.mxu0 %v1439_v13  ;;  %1465 = vmatprep.subr.bf16.mxu1 %v1439_v13  ;;  %v62_v51 = vmul.f32 14.285714, %v46_v47  ;;  %v63_v53 = vmul.f32 14.285714, %v47_v49  ;;  %v40_v54 = vld [vmem:[%s2612_s0 + $0x28] sm:$0xff]  ;;  %v41_v56 = vld [vmem:[%s2612_s0 + $0x30] sm:$0xff] }
  0x20   :  { %v48_v55 = vld [vmem:[%s2612_s0 + $0x68] sm:$0xff]  ;;  %v49_v57 = vld [vmem:[%s2612_s0 + $0x70] sm:$0xff]  ;;  %v56_v58 = vmul.f32 14.285714, %v40_v54  ;;  %v57_v60 = vmul.f32 14.285714, %v41_v56 }
  0x21   :  { %465 = vperm.xlu1 %1486, %v437_v21   ;;  %v64_v59 = vmul.f32 14.285714, %v48_v55  ;;  %v42_v61 = vld [vmem:[%s2612_s0 + $0x38] sm:$0xff]  ;;  %v65_v62 = vmul.f32 14.285714, %v49_v57  ;;  %v327_v6 = vadd.s32 8, %v1757_v3 }
  0x22   :  { %v50_v63 = vld [vmem:[%s2612_s0 + $0x78] sm:$0xff]  ;;  %v58_v0 = vmul.f32 14.285714, %v42_v61  ;;  %v1770_v7 = vld [vmem:[%s2615_s3] ss:$0 sm:$0xff]  ;;  %v2655_v8 = vsel %vm1774_vm3, 4294967295, %v2654_v8 }
  0x23   :  { %v66_v1 = vmul.f32 14.285714, %v50_v63  ;;  %v2657_v10 = vsel %vm1780_vm4, 4294967295, %v2656_v10  ;;  %vm346_vm6 = vcmp.ne.s32.totalorder %v327_v6, %v1760_v5  ;;  %101 = vst.msk [vmem:[#allocation4 + $0x8] sm:$0xff] %vm2636_vm13, %v2617_v12  ;;  %102 = vst.msk [vmem:[#allocation4 + $0x10] sm:$0xff] %vm2636_vm13, %v2617_v12  ;;  %v1644_v18 = vmov -inf  }
  0x24   :  { %vm1796_vm10 = vmand %vm346_vm6, %vm2649_vm2  ;;  %103 = vst.msk [vmem:[#allocation4 + $0x18] sm:$0xff] %vm2636_vm13, %v2617_v12  ;;  %v1030_v41 = vld [vmem:[#allocation6] sm:$0xff]  ;;  %v445_v63 = vld [vmem:[%s2614_s2 + $0x68] sm:$0xff] }
  0x25   :  { %471 = vperm.xlu1 %1486, %v439_v24   ;;  %104 = vst.msk [vmem:[#allocation4 + $0x20] sm:$0xff] %vm2636_vm13, %v2617_v12  ;;  %105 = vst.msk [vmem:[#allocation4 + $0x28] sm:$0xff] %vm2636_vm13, %v2617_v12  ;;  %v331_v24 = vadd.s32 40, %v1757_v3  ;;  %v440_v61 = vld [vmem:[%s2614_s2 + $0x40] sm:$0xff] }
  0x26   :  { %1442 = vmatpush3.bf16.xpose.msra.mxu0 %v1439_v13  ;;  %1473 = vmatpush3.bf16.xpose.msra.mxu1 %v1439_v13  ;;  %106 = vst.msk [vmem:[#allocation4 + $0x30] sm:$0xff] %vm2636_vm13, %v2617_v12  ;;  %107 = vst.msk [vmem:[#allocation4 + $0x38] sm:$0xff] %vm2636_vm13, %v2617_v12 }
  0x27   :  { %1444 = vmatprep.subr.bf16.mxu0 %v1443_v20  ;;  %1466 = vmatprep.subr.bf16.mxu1 %v1443_v20  ;;  %108 = vst.msk [vmem:[#allocation4 + $0x40] sm:$0xff] %vm2636_vm13, %v2617_v12  ;;  %109 = vst.msk [vmem:[#allocation4 + $0x48] sm:$0xff] %vm2636_vm13, %v2617_v12 }
  0x28   :  { %110 = vst.msk [vmem:[#allocation4 + $0x50] sm:$0xff] %vm2636_vm13, %v2617_v12  ;;  %111 = vst.msk [vmem:[#allocation4 + $0x58] sm:$0xff] %vm2636_vm13, %v2617_v12 }
  0x29   :  { %477 = vperm.xlu1 %1486, %v441_v26   ;;  %112 = vst.msk [vmem:[#allocation4 + $0x60] sm:$0xff] %vm2636_vm13, %v2617_v12  ;;  %113 = vst.msk [vmem:[#allocation4 + $0x68] sm:$0xff] %vm2636_vm13, %v2617_v12 }
  0x2a   :  { %114 = vst.msk [vmem:[#allocation4 + $0x70] sm:$0xff] %vm2636_vm13, %v2617_v12  ;;  %115 = vst.msk [vmem:[#allocation4 + $0x78] sm:$0xff] %vm2636_vm13, %v2617_v12 }
  0x2b   :  { %116 = vst.msk [vmem:[#allocation5] sm:$0xff] %vm2636_vm13, %v2617_v12  ;;  %117 = vst.msk [vmem:[#allocation5 + $0x8] sm:$0xff] %vm2636_vm13, %v2617_v12 }
  0x2c   :  { %118 = vst.msk [vmem:[#allocation5 + $0x10] sm:$0xff] %vm2636_vm13, %v2617_v12  ;;  %119 = vst.msk [vmem:[#allocation5 + $0x18] sm:$0xff] %vm2636_vm13, %v2617_v12 }
  0x2d   :  { %483 = vperm.xlu1 %1486, %v443_v29   ;;  %120 = vst.msk [vmem:[#allocation5 + $0x20] sm:$0xff] %vm2636_vm13, %v2617_v12  ;;  %121 = vst.msk [vmem:[#allocation5 + $0x28] sm:$0xff] %vm2636_vm13, %v2617_v12 }
  0x2e   :  { %1446 = vmatpush3.bf16.xpose.msra.mxu0 %v1443_v20  ;;  %1474 = vmatpush3.bf16.xpose.msra.mxu1 %v1443_v20  ;;  %122 = vst.msk [vmem:[#allocation5 + $0x30] sm:$0xff] %vm2636_vm13, %v2617_v12  ;;  %123 = vst.msk [vmem:[#allocation5 + $0x38] sm:$0xff] %vm2636_vm13, %v2617_v12 }
  0x2f   :  { %1448 = vmatprep.subr.bf16.mxu0 %v1447_v25  ;;  %1467 = vmatprep.subr.bf16.mxu1 %v1447_v25  ;;  %124 = vst.msk [vmem:[#allocation5 + $0x40] sm:$0xff] %vm2636_vm13, %v2617_v12  ;;  %125 = vst.msk [vmem:[#allocation5 + $0x48] sm:$0xff] %vm2636_vm13, %v2617_v12 }
  0x30   :  { %126 = vst.msk [vmem:[#allocation5 + $0x50] sm:$0xff] %vm2636_vm13, %v2617_v12  ;;  %127 = vst.msk [vmem:[#allocation5 + $0x58] sm:$0xff] %vm2636_vm13, %v2617_v12 }
  0x31   :  { %486 = vperm.xlu1 %1486, %v444_v31   ;;  %128 = vst.msk [vmem:[#allocation5 + $0x60] sm:$0xff] %vm2636_vm13, %v2617_v12  ;;  %129 = vst.msk [vmem:[#allocation5 + $0x68] sm:$0xff] %vm2636_vm13, %v2617_v12 }
  0x32   :  { %130 = vst.msk [vmem:[#allocation5 + $0x70] sm:$0xff] %vm2636_vm13, %v2617_v12  ;;  %131 = vst.msk [vmem:[#allocation5 + $0x78] sm:$0xff] %vm2636_vm13, %v2617_v12 }
  0x33   :  { %133 = vst.msk [vmem:[#allocation6 + $0x8] sm:$0xff] %vm2636_vm13, %v2617_v12  ;;  %134 = vst.msk [vmem:[#allocation6 + $0x10] sm:$0xff] %vm2636_vm13, %v2617_v12 }
  0x34   :  { %135 = vst.msk [vmem:[#allocation6 + $0x18] sm:$0xff] %vm2636_vm13, %v2617_v12  ;;  %136 = vst.msk [vmem:[#allocation6 + $0x20] sm:$0xff] %vm2636_vm13, %v2617_v12 }
  0x35   :  { %137 = vst.msk [vmem:[#allocation6 + $0x28] sm:$0xff] %vm2636_vm13, %v2617_v12  ;;  %138 = vst.msk [vmem:[#allocation6 + $0x30] sm:$0xff] %vm2636_vm13, %v2617_v12 }
  0x36   :  { %1450 = vmatpush3.bf16.xpose.msra.mxu0 %v1447_v25  ;;  %1475 = vmatpush3.bf16.xpose.msra.mxu1 %v1447_v25  ;;  %139 = vst.msk [vmem:[#allocation6 + $0x38] sm:$0xff] %vm2636_vm13, %v2617_v12  ;;  %140 = vst.msk [vmem:[#allocation6 + $0x40] sm:$0xff] %vm2636_vm13, %v2617_v12  ;;  %v2660_v25 = vmov 0 }
  0x37   :  { %1452 = vmatprep.subr.bf16.mxu0 %v1451_v30  ;;  %1468 = vmatprep.subr.bf16.mxu1 %v1451_v30  ;;  %141 = vst.msk [vmem:[#allocation6 + $0x48] sm:$0xff] %vm2636_vm13, %v2617_v12  ;;  %142 = vst.msk [vmem:[#allocation6 + $0x50] sm:$0xff] %vm2636_vm13, %v2617_v12  ;;  %v2661_v25 = vsel %vm1934_vm0, 4294967295, %v2660_v25 }
  0x38   :  { %143 = vst.msk [vmem:[#allocation6 + $0x58] sm:$0xff] %vm2636_vm13, %v2617_v12  ;;  %144 = vst.msk [vmem:[#allocation6 + $0x60] sm:$0xff] %vm2636_vm13, %v2617_v12 }
  0x39   :  { %145 = vst.msk [vmem:[#allocation6 + $0x68] sm:$0xff] %vm2636_vm13, %v2617_v12  ;;  %146 = vst.msk [vmem:[#allocation6 + $0x70] sm:$0xff] %vm2636_vm13, %v2617_v12 }
  0x3a   :  { %147 = vst.msk [vmem:[#allocation6 + $0x78] sm:$0xff] %vm2636_vm13, %v2617_v12  ;;  %93 = vst.msk [vmem:[#allocation3 + $0x48] sm:$0xff] %vm2636_vm13, %v1644_v18 }
  0x3b   :  { %84 = vst.msk [vmem:[#allocation3] sm:$0xff] %vm2636_vm13, %v1644_v18  ;;  %85 = vst.msk [vmem:[#allocation3 + $0x8] sm:$0xff] %vm2636_vm13, %v1644_v18 }
  0x3c   :  { %86 = vst.msk [vmem:[#allocation3 + $0x10] sm:$0xff] %vm2636_vm13, %v1644_v18  ;;  %87 = vst.msk [vmem:[#allocation3 + $0x18] sm:$0xff] %vm2636_vm13, %v1644_v18 }
  0x3d   :  { %88 = vst.msk [vmem:[#allocation3 + $0x20] sm:$0xff] %vm2636_vm13, %v1644_v18  ;;  %89 = vst.msk [vmem:[#allocation3 + $0x28] sm:$0xff] %vm2636_vm13, %v1644_v18 }
  0x3e   :  { %1454 = vmatpush3.bf16.xpose.msra.mxu0 %v1451_v30  ;;  %1476 = vmatpush3.bf16.xpose.msra.mxu1 %v1451_v30  ;;  %90 = vst.msk [vmem:[#allocation3 + $0x30] sm:$0xff] %vm2636_vm13, %v1644_v18  ;;  %91 = vst.msk [vmem:[#allocation3 + $0x38] sm:$0xff] %vm2636_vm13, %v1644_v18 }
  0x3f   :  { %1456 = vmatprep.subr.bf16.mxu0 %v1455_v34  ;;  %1469 = vmatprep.subr.bf16.mxu1 %v1455_v34  ;;  %92 = vst.msk [vmem:[#allocation3 + $0x40] sm:$0xff] %vm2636_vm13, %v1644_v18  ;;  %94 = vst.msk [vmem:[#allocation3 + $0x50] sm:$0xff] %vm2636_vm13, %v1644_v18 }
  0x40   :  { %95 = vst.msk [vmem:[#allocation3 + $0x58] sm:$0xff] %vm2636_vm13, %v1644_v18  ;;  %96 = vst.msk [vmem:[#allocation3 + $0x60] sm:$0xff] %vm2636_vm13, %v1644_v18 }
  0x41   :  { %97 = vst.msk [vmem:[#allocation3 + $0x68] sm:$0xff] %vm2636_vm13, %v1644_v18  ;;  %98 = vst.msk [vmem:[#allocation3 + $0x70] sm:$0xff] %vm2636_vm13, %v1644_v18 }
  0x42   :  { %99 = vst.msk [vmem:[#allocation3 + $0x78] sm:$0xff] %vm2636_vm13, %v1644_v18  ;;  %v2039_v2 = vld [vmem:[#allocation3 + $0x8] sm:$0xff]  ;;  %v2049_v18 = vld [vmem:[#allocation3] sm:$0xff] }
  0x43   :  { %2665 = vst [vmem:[#allocation11_spill] sm:$0xff] %v2049_v18 }
  0x46   :  { %1458 = vmatpush3.bf16.xpose.msra.mxu0 %v1455_v34  ;;  %1477 = vmatpush3.bf16.xpose.msra.mxu1 %v1455_v34 }
  0x47   :  { %1460 = vmatprep.subr.bf16.mxu0 %v1459_v37  ;;  %1470 = vmatprep.subr.bf16.mxu1 %v1459_v37 }
  0x4e   :  { %1462 = vmatpush3.bf16.xpose.msra.mxu0 %v1459_v37  ;;  %1478 = vmatpush3.bf16.xpose.msra.mxu1 %v1459_v37 }
  0x55   :  { %1408 = vmatmul.mubr.f32.vlgmr.msra.gmra.mrb[0].mxu0 %v52_v42  ;;  %1420 = vmatmul.mubr.f32.vlgmr.msra.gmra.mrb[0].mxu1 %v60_v43 }
  0x56   :  { %1410 = vmatprep.mubr.f32.mxu0 %v53_v44  ;;  %1422 = vmatprep.mubr.f32.mxu1 %v61_v45 }
  0x59   :  { %1411 = vmatmul.mubr.f32.gmra.mrb[2].mxu0 %v54_v50  ;;  %1423 = vmatmul.mubr.f32.gmra.mrb[2].mxu1 %v62_v51  ;;  %v1031_v50 = vld [vmem:[#allocation6 + $0x8] sm:$0xff]  ;;  %v1032_v51 = vld [vmem:[#allocation6 + $0x10] sm:$0xff] }
  0x5a   :  { %1413 = vmatprep.mubr.f32.mxu0 %v55_v52  ;;  %1425 = vmatprep.mubr.f32.mxu1 %v63_v53 }
  0x5d   :  { %1414 = vmatmul.mubr.f32.gmra.mrb[4].mxu0 %v56_v58  ;;  %1426 = vmatmul.mubr.f32.gmra.mrb[4].mxu1 %v64_v59  ;;  %v447_v58 = vld [vmem:[%s2614_s2 + $0x78] sm:$0xff]  ;;  %v436_v59 = vld [vmem:[%s2614_s2 + $0x20] sm:$0xff] }
  0x5e   :  { %1416 = vmatprep.mubr.f32.mxu0 %v57_v60  ;;  %1428 = vmatprep.mubr.f32.mxu1 %v65_v62  ;;  %v438_v60 = vld [vmem:[%s2614_s2 + $0x30] sm:$0xff] }
  0x5f   :  { %v442_v62 = vld [vmem:[%s2614_s2 + $0x50] sm:$0xff] }
  0x61   :  { %1417 = vmatmul.mubr.f32.gmra.mrb[6].mxu0 %v58_v0  ;;  %1429 = vmatmul.mubr.f32.gmra.mrb[6].mxu1 %v66_v1  ;;  %v446_v0 = vld [vmem:[%s2614_s2 + $0x70] sm:$0xff]  ;;  %v2037_v1 = vld [vmem:[#allocation3 + $0x48] sm:$0xff] }
  0x98   :  { %v457_v9 = vpop.permute.xlu1 %456  ;;  %v451_v11 = vpop.permute.xlu0 %450 }
  0x99   :  { %vm503_vm5 = vcmp.eq.s32.totalorder %v457_v9, %v1770_v7  ;;  %vm501_vm7 = vcmp.eq.s32.totalorder %v451_v11, %v1770_v7 }
  0x9a   :  { %vm519_vm8 = vmand %vm503_vm5, %vm1774_vm3  ;;  %vm350_vm5 = vcmp.ne.s32.totalorder %v331_v24, %v1760_v5 }
  0x9b   :  { %vm517_vm9 = vmand %vm501_vm7, %vm1780_vm4  ;;  %v1803_v16 = vsel %vm519_vm8, 1.0, %v2617_v12 }
  0x9c   :  { %v1792_v13 = vsel %vm517_vm9, 1.0, %v2617_v12  ;;  %v454_v15 = vpop.permute.xlu0 %453  ;;  %v460_v19 = vpop.permute.xlu1 %459  ;;  %vm1957_vm7 = vmand %vm350_vm5, %vm2649_vm2 }
  0x9d   :  { %1046 = vadd.xlane.f32.xlu1 %v1792_v13  ;;  %vm502_vm11 = vcmp.eq.s32.totalorder %v454_v15, %v1770_v7  ;;  %vm504_vm15 = vcmp.eq.s32.totalorder %v460_v19, %v1770_v7  ;;  %v2663_v32 = vsel %vm1957_vm7, 4294967295, %v2662_v32  ;;  %v2047_v15 = vld [vmem:[#allocation3 + $0x40] sm:$0xff]  ;;  %v341_v19 = vadd.s32 120, %v1757_v3 }
  0x9e   :  { %vm518_vm12 = vmand %vm502_vm11, %vm1796_vm10 }
  0x9f   :  { %v1808_v17 = vsel %vm518_vm12, 1.0, %v2617_v12  ;;  %vm520_vm1 = vmand %vm504_vm15, %vm1934_vm0  ;;  %vm360_vm9 = vcmp.ne.s32.totalorder %v341_v19, %v1760_v5  ;;  %v2686_v19 = vmov 0 }
  0xa0   :  { %1048 = vadd.xlane.f32.xlu0 %v1808_v17  ;;  %v466_v20 = vpop.permute.xlu1 %465  ;;  %v1330_v31 = vsel %vm520_vm1, 1.0, %v2617_v12  ;;  %vm2176_vm11 = vmand %vm360_vm9, %vm2649_vm2 }
  0xa1   :  { %1050 = vadd.xlane.f32.xlu1 %v1803_v16  ;;  %vm506_vm6 = vcmp.eq.s32.totalorder %v466_v20, %v1770_v7  ;;  %v2145_v20 = vld [vmem:[#allocation3 + $0x68] sm:$0xff]  ;;  %v2687_v19 = vsel %vm2176_vm11, 4294967295, %v2686_v19 }
  0xa2   :  { %vm522_vm8 = vmand %vm506_vm6, %vm1957_vm7  ;;  %2682 = vst [vmem:[#allocation28_spill] sm:$0xff] %v2145_v20 }
  0xa3   :  { %v1983_v42 = vsel %vm522_vm8, 1.0, %v2617_v12  ;;  %v2164_v12 = vld [vmem:[#allocation3 + $0x38] sm:$0xff] }
  0xa4   :  { %v1924_v21 = vpop.permute.xlu1 %471  ;;  %2685 = vst [vmem:[#allocation31_spill] sm:$0xff] %v2164_v12 }
  0xa8   :  { %v1927_v23 = vpop.permute.xlu1 %477 }
  0xac   :  { %v1938_v26 = vpop.permute.xlu1 %483 }
  0xb0   :  { %v1976_v38 = vpop.permute.xlu1 %486 }
 0x128   :  { %v1943_v27 = vpop.f32.mrb[0].mxu0  ;;  %v1945_v28 = vpop.f32.mrb[0].mxu1 }
 0x129   :  { %599 = vmax.xlane.f32.xlu0 %v1945_v28  ;;  %v1948_v29 = vpop.f32.mrb[1].mxu1  ;;  %583 = vmax.xlane.f32.xlu1 %v1943_v27  ;;  %v1951_v30 = vpop.f32.mrb[1].mxu0 }
 0x12a   :  { %v1047_v46 = vpop.xlane.xlu1 %1046 }
 0x12b   :  { %v1078_v47 = vadd.f32 %v1047_v46, %v1030_v41  ;;  %v2066_v46 = vld [vmem:[#allocation3 + $0x50] sm:$0xff] }
 0x12c   :  { %v1961_v33 = vpop.f32.mrb[2].mxu0  ;;  %v1963_v34 = vpop.f32.mrb[2].mxu1  ;;  %2667 = vst [vmem:[#allocation13_spill] sm:$0xff] %v2066_v46 }
 0x12d   :  { %597 = vmax.xlane.f32.xlu1 %v1948_v29  ;;  %581 = vmax.xlane.f32.xlu0 %v1951_v30  ;;  %v1967_v35 = vpop.f32.mrb[3].mxu0  ;;  %v1969_v36 = vpop.f32.mrb[3].mxu1  ;;  %v1974_v37 = vmul.f32 %v1961_v33, %v1330_v31  ;;  %1094 = vst.msk [vmem:[#allocation6] sm:$0xff] %vm2636_vm13, %v1078_v47  ;;  %v2068_v47 = vld [vmem:[#allocation3 + $0x18] sm:$0xff] }
 0x12e   :  { %v1049_v54 = vpop.xlane.xlu0 %1048  ;;  %v1051_v55 = vpop.xlane.xlu1 %1050  ;;  %2668 = vst [vmem:[#allocation14_spill] sm:$0xff] %v2068_v47 }
 0x12f   :  { %v1079_v56 = vadd.f32 %v1049_v54, %v1031_v50  ;;  %v1080_v57 = vadd.f32 %v1051_v55, %v1032_v51  ;;  %v2147_v51 = vld [vmem:[#allocation3 + $0x70] sm:$0xff] }
 0x130   :  { %v1978_v39 = vpop.f32.mrb[4].mxu0  ;;  %v1980_v40 = vpop.f32.mrb[4].mxu1  ;;  %2683 = vst [vmem:[#allocation29_spill] sm:$0xff] %v2147_v51 }
 0x131   :  { %v1985_v43 = vpop.f32.mrb[5].mxu1  ;;  %601 = vmax.xlane.f32.xlu1 %v1969_v36  ;;  %587 = vmax.xlane.f32.xlu0 %v1961_v33  ;;  %v1989_v44 = vpop.f32.mrb[5].mxu0  ;;  %v1993_v45 = vmul.f32 %v1978_v39, %v1983_v42  ;;  %1095 = vst.msk [vmem:[#allocation6 + $0x8] sm:$0xff] %vm2636_vm13, %v1079_v56  ;;  %1096 = vst.msk [vmem:[#allocation6 + $0x10] sm:$0xff] %vm2636_vm13, %v1080_v57 }
 0x134   :  { %v1995_v48 = vpop.f32.mrb[6].mxu0  ;;  %v1997_v49 = vpop.f32.mrb[6].mxu1 }
 0x135   :  { %603 = vmax.xlane.f32.xlu0 %v1963_v34  ;;  %589 = vmax.xlane.f32.xlu1 %v1989_v44  ;;  %v2001_v52 = vpop.f32.mrb[7].mxu0  ;;  %v2003_v53 = vpop.f32.mrb[7].mxu1 }
 0x139   :  { %585 = vmax.xlane.f32.xlu0 %v1967_v35  ;;  %605 = vmax.xlane.f32.xlu1 %v1985_v43 }
 0x13d   :  { %591 = vmax.xlane.f32.xlu0 %v1978_v39  ;;  %593 = vmax.xlane.f32.xlu1 %v2001_v52 }
 0x141   :  { %607 = vmax.xlane.f32.xlu0 %v1980_v40  ;;  %609 = vmax.xlane.f32.xlu1 %v2003_v53 }
 0x145   :  { %595 = vmax.xlane.f32.xlu0 %v1995_v48 }
 0x149   :  { %611 = vmax.xlane.f32.xlu0 %v1997_v49 }
 0x14d   :  { %1052 = vadd.xlane.f32.xlu0 %v1330_v31 }
 0x152   :  { %495 = vperm.xlu1 %1486, %v447_v58   ;;  %v2086_v58 = vld [vmem:[#allocation3 + $0x58] sm:$0xff] }
 0x153   :  { %2671 = vst [vmem:[#allocation17_spill] sm:$0xff] %v2086_v58 }
 0x163   :  { %462 = vperm.xlu0 %1485, %v436_v59   ;;  %v2088_v59 = vld [vmem:[#allocation3 + $0x20] sm:$0xff] }
 0x164   :  { %2672 = vst [vmem:[#allocation18_spill] sm:$0xff] %v2088_v59 }
 0x167   :  { %468 = vperm.xlu0 %1485, %v438_v60  }
 0x16b   :  { %474 = vperm.xlu0 %1485, %v440_v61   ;;  %v2126_v61 = vld [vmem:[#allocation3 + $0x30] sm:$0xff] }
 0x16c   :  { %2680 = vst [vmem:[#allocation26_spill] sm:$0xff] %v2126_v61 }
 0x16f   :  { %480 = vperm.xlu0 %1485, %v442_v62  }
 0x173   :  { %489 = vperm.xlu0 %1485, %v445_v63  }
 0x177   :  { %492 = vperm.xlu0 %1485, %v446_v0  }
 0x1b6   :  { %v600_v4 = vpop.xlane.xlu0 %599  ;;  %v584_v6 = vpop.xlane.xlu1 %583 }
 0x1b7   :  { %v2042_v9 = vmax.f32 %v2037_v1, %v600_v4  ;;  %v2045_v11 = vmax.f32 %v2039_v2, %v584_v6  ;;  %v2105_v6 = vld [vmem:[#allocation3 + $0x10] sm:$0xff] }
 0x1b8   :  { %2675 = vst [vmem:[#allocation21_spill] sm:$0xff] %v2105_v6 }
 0x1b9   :  { %2664 = vst [vmem:[#allocation10_spill] sm:$0xff] %v2042_v9  ;;  %927 = vst.msk [vmem:[#allocation3 + $0x48] sm:$0xff] %vm2636_vm13, %v2042_v9  ;;  %684 = vperm.xlu1 %1486, %v2045_v11  }
 0x1ba   :  { %919 = vst.msk [vmem:[#allocation3 + $0x8] sm:$0xff] %vm2636_vm13, %v2045_v11  ;;  %v598_v22 = vpop.xlane.xlu1 %597  ;;  %v582_v24 = vpop.xlane.xlu0 %581 }
 0x1bb   :  { %v2061_v31 = vmax.f32 %v2047_v15, %v598_v22  ;;  %v2064_v41 = vmax.f32 %v2049_v18, %v582_v24  ;;  %v2107_v22 = vld [vmem:[#allocation3 + $0x60] sm:$0xff]  ;;  %v2124_v24 = vld [vmem:[#allocation3 + $0x28] sm:$0xff]  ;;  %v338_v18 = vadd.s32 96, %v1757_v3 }
 0x1bc   :  { %2676 = vst [vmem:[#allocation22_spill] sm:$0xff] %v2107_v22  ;;  %2679 = vst [vmem:[#allocation25_spill] sm:$0xff] %v2124_v24 }
 0x1bd   :  { %2666 = vst [vmem:[#allocation12_spill] sm:$0xff] %v2064_v41  ;;  %926 = vst.msk [vmem:[#allocation3 + $0x40] sm:$0xff] %vm2636_vm13, %v2061_v31  ;;  %719 = vperm.xlu0 %1485, %v2061_v31   ;;  %724 = vperm.xlu1 %1486, %v2042_v9  }
 0x1be   :  { %918 = vst.msk [vmem:[#allocation3] sm:$0xff] %vm2636_vm13, %v2064_v41  ;;  %v602_v54 = vpop.xlane.xlu1 %601  ;;  %v588_v55 = vpop.xlane.xlu0 %587 }
 0x1bf   :  { %v2081_v56 = vmax.f32 %v2066_v46, %v602_v54  ;;  %v2084_v57 = vmax.f32 %v2068_v47, %v588_v55  ;;  %v2698_v46 = vmov 0  ;;  %v332_v47 = vadd.s32 48, %v1757_v3 }
 0x1c1   :  { %2669 = vst [vmem:[#allocation15_spill] sm:$0xff] %v2081_v56  ;;  %2670 = vst [vmem:[#allocation16_spill] sm:$0xff] %v2084_v57  ;;  %679 = vperm.xlu1 %1486, %v2064_v41  }
 0x1c2   :  { %928 = vst.msk [vmem:[#allocation3 + $0x50] sm:$0xff] %vm2636_vm13, %v2081_v56  ;;  %921 = vst.msk [vmem:[#allocation3 + $0x18] sm:$0xff] %vm2636_vm13, %v2084_v57  ;;  %v604_v62 = vpop.xlane.xlu0 %603  ;;  %v590_v63 = vpop.xlane.xlu1 %589 }
 0x1c3   :  { %v2100_v0 = vmax.f32 %v2086_v58, %v604_v62  ;;  %v2103_v4 = vmax.f32 %v2088_v59, %v590_v63  ;;  %v1033_v59 = vld [vmem:[#allocation6 + $0x18] sm:$0xff] }
 0x1c5   :  { %2673 = vst [vmem:[#allocation19_spill] sm:$0xff] %v2100_v0  ;;  %2674 = vst [vmem:[#allocation20_spill] sm:$0xff] %v2103_v4  ;;  %694 = vperm.xlu1 %1486, %v2084_v57  }
 0x1c6   :  { %929 = vst.msk [vmem:[#allocation3 + $0x58] sm:$0xff] %vm2636_vm13, %v2100_v0  ;;  %922 = vst.msk [vmem:[#allocation3 + $0x20] sm:$0xff] %vm2636_vm13, %v2103_v4  ;;  %v586_v55 = vpop.xlane.xlu0 %585  ;;  %v606_v62 = vpop.xlane.xlu1 %605 }
 0x1c7   :  { %v2119_v63 = vmax.f32 %v2105_v6, %v586_v55  ;;  %v2122_v60 = vmax.f32 %v2107_v22, %v606_v62 }
 0x1c9   :  { %2677 = vst [vmem:[#allocation23_spill] sm:$0xff] %v2119_v63  ;;  %2678 = vst [vmem:[#allocation24_spill] sm:$0xff] %v2122_v60  ;;  %689 = vperm.xlu0 %1485, %v2119_v63   ;;  %734 = vperm.xlu1 %1486, %v2100_v0   ;;  %v330_v0 = vadd.s32 32, %v1757_v3 }
 0x1ca   :  { %920 = vst.msk [vmem:[#allocation3 + $0x10] sm:$0xff] %vm2636_vm13, %v2119_v63  ;;  %930 = vst.msk [vmem:[#allocation3 + $0x60] sm:$0xff] %vm2636_vm13, %v2122_v60  ;;  %v592_v55 = vpop.xlane.xlu0 %591  ;;  %v594_v62 = vpop.xlane.xlu1 %593  ;;  %v334_v63 = vadd.s32 64, %v1757_v3 }
 0x1cb   :  { %v2140_v50 = vmax.f32 %v2124_v24, %v592_v55  ;;  %v2143_v54 = vmax.f32 %v2126_v61, %v594_v62 }
 0x1cc   :  { %vm353_vm15 = vcmp.ne.s32.totalorder %v334_v63, %v1760_v5 }
 0x1cd   :  { %2681 = vst [vmem:[#allocation27_spill] sm:$0xff] %v2140_v50  ;;  %923 = vst.msk [vmem:[#allocation3 + $0x28] sm:$0xff] %vm2636_vm13, %v2140_v50  ;;  %729 = vperm.xlu0 %1485, %v2081_v56   ;;  %704 = vperm.xlu1 %1486, %v2140_v50   ;;  %v2694_v56 = vmov 0 }
 0x1ce   :  { %924 = vst.msk [vmem:[#allocation3 + $0x30] sm:$0xff] %vm2636_vm13, %v2143_v54  ;;  %v608_v55 = vpop.xlane.xlu0 %607  ;;  %v610_v62 = vpop.xlane.xlu1 %609  ;;  %vm2219_vm1 = vmand %vm353_vm15, %vm2649_vm2 }
 0x1cf   :  { %v2159_v61 = vmax.f32 %v2145_v20, %v608_v55  ;;  %v2162_v22 = vmax.f32 %v2147_v51, %v610_v62  ;;  %v2184_v51 = vld [vmem:[#allocation3 + $0x78] sm:$0xff]  ;;  %v2690_v20 = vmov 0.0  }
 0x1d0   :  { %2689 = vst [vmem:[#allocation33_spill] sm:$0xff] %v2184_v51 }
 0x1d1   :  { %2684 = vst [vmem:[#allocation30_spill] sm:$0xff] %v2159_v61  ;;  %931 = vst.msk [vmem:[#allocation3 + $0x68] sm:$0xff] %vm2636_vm13, %v2159_v61  ;;  %699 = vperm.xlu0 %1485, %v2103_v4   ;;  %744 = vperm.xlu1 %1486, %v2159_v61   ;;  %v335_v61 = vadd.s32 72, %v1757_v3 }
 0x1d2   :  { %932 = vst.msk [vmem:[#allocation3 + $0x70] sm:$0xff] %vm2636_vm13, %v2162_v22  ;;  %v596_v55 = vpop.xlane.xlu0 %595  ;;  %v496_v62 = vpop.permute.xlu1 %495 }
 0x1d3   :  { %v2181_v24 = vmax.f32 %v2164_v12, %v596_v55  ;;  %vm516_vm12 = vcmp.eq.s32.totalorder %v496_v62, %v1770_v7  ;;  %vm354_vm8 = vcmp.ne.s32.totalorder %v335_v61, %v1760_v5 }
 0x1d4   :  { %vm532_vm14 = vmand %vm516_vm12, %vm2176_vm11 }
 0x1d5   :  { %2688 = vst [vmem:[#allocation32_spill] sm:$0xff] %v2181_v24  ;;  %925 = vst.msk [vmem:[#allocation3 + $0x38] sm:$0xff] %vm2636_vm13, %v2181_v24  ;;  %739 = vperm.xlu0 %1485, %v2122_v60   ;;  %714 = vperm.xlu1 %1486, %v2181_v24   ;;  %v2195_v55 = vsel %vm532_vm14, 1.0, %v2690_v20 }
 0x1d6   :  { %v612_v50 = vpop.xlane.xlu0 %611  ;;  %v2199_v62 = vmul.f32 %v1997_v49, %v2195_v55  ;;  %vm2240_vm15 = vmand %vm354_vm8, %vm2649_vm2 }
 0x1d7   :  { %v2202_v4 = vmax.f32 %v2184_v51, %v612_v50  ;;  %v336_v50 = vadd.s32 80, %v1757_v3  ;;  %v333_v51 = vadd.s32 56, %v1757_v3 }
 0x1d9   :  { %2691 = vst [vmem:[#allocation34_spill] sm:$0xff] %v2202_v4  ;;  %933 = vst.msk [vmem:[#allocation3 + $0x78] sm:$0xff] %vm2636_vm13, %v2202_v4  ;;  %754 = vperm.xlu1 %1486, %v2202_v4   ;;  %vm355_vm5 = vcmp.ne.s32.totalorder %v336_v50, %v1760_v5  ;;  %vm352_vm9 = vcmp.ne.s32.totalorder %v333_v51, %v1760_v5  ;;  %v340_v51 = vadd.s32 112, %v1757_v3 }
 0x1da   :  { %v1053_v24 = vpop.xlane.xlu0 %1052  ;;  %vm2234_vm14 = vmand %vm355_vm5, %vm2649_vm2  ;;  %vm508_vm5 = vcmp.eq.s32.totalorder %v1924_v21, %v1770_v7 }
 0x1db   :  { %v1081_v12 = vadd.f32 %v1053_v24, %v1033_v59  ;;  %v339_v59 = vadd.s32 104, %v1757_v3  ;;  %v337_v24 = vadd.s32 88, %v1757_v3  ;;  %v2695_v56 = vsel %vm2234_vm14, 4294967295, %v2694_v56 }
 0x1dc   :  { %vm359_vm3 = vcmp.ne.s32.totalorder %v340_v51, %v1760_v5  ;;  %v951_v3 = vmul.f32 %v1943_v27, %v1808_v17 }
 0x1dd   :  { %1097 = vst.msk [vmem:[#allocation6 + $0x18] sm:$0xff] %vm2636_vm13, %v1081_v12  ;;  %vm358_vm13 = vcmp.ne.s32.totalorder %v339_v59, %v1760_v5  ;;  %vm356_vm8 = vcmp.ne.s32.totalorder %v337_v24, %v1760_v5  ;;  %v2700_v59 = vmov 0 }
 0x1de   :  { %vm2264_vm7 = vmand %vm358_vm13, %vm2649_vm2  ;;  %vm349_vm13 = vcmp.ne.s32.totalorder %v330_v0, %v1760_v5  ;;  %v2746_v0 = vld [vmem:[#allocation10_spill] sm:$0xff] }
 0x1df   :  { %v2701_v59 = vsel %vm2264_vm7, 4294967295, %v2700_v59  ;;  %vm2303_vm0 = vmand %vm349_vm13, %vm2649_vm2 }
 0x1e2   :  { %v463_v60 = vpop.permute.xlu0 %462 }
 0x1e6   :  { %v2211_v6 = vpop.permute.xlu0 %468 }
 0x1ea   :  { %v475_v12 = vpop.permute.xlu0 %474 }
 0x1eb   :  { %vm509_vm6 = vcmp.eq.s32.totalorder %v475_v12, %v1770_v7 }
 0x1ec   :  { %vm525_vm12 = vmand %vm509_vm6, %vm2219_vm1 }
 0x1ed   :  { %v1335_v63 = vsel %vm525_vm12, 1.0, %v2690_v20  ;;  %vm2254_vm12 = vmand %vm352_vm9, %vm2649_vm2 }
 0x1ee   :  { %v481_v50 = vpop.permute.xlu0 %480  ;;  %v2247_v12 = vmul.f32 %v1335_v63, %v1948_v29  ;;  %v2699_v46 = vsel %vm2254_vm12, 4294967295, %v2698_v46  ;;  %vm2271_vm9 = vmand %vm508_vm5, %vm2254_vm12 }
 0x1ef   :  { %vm511_vm6 = vcmp.eq.s32.totalorder %v481_v50, %v1770_v7  ;;  %vm2296_vm12 = vmand %vm359_vm3, %vm2649_vm2  ;;  %v2314_v41 = vsel %vm2271_vm9, 1.0, %v2690_v20  ;;  %vm507_vm9 = vcmp.eq.s32.totalorder %v2211_v6, %v1770_v7 }
 0x1f0   :  { %vm527_vm11 = vmand %vm511_vm6, %vm2234_vm14  ;;  %v957_v14 = vmul.f32 %v1995_v48, %v2314_v41 }
 0x1f1   :  { %v1337_v21 = vsel %vm527_vm11, 1.0, %v2690_v20  ;;  %vm2283_vm14 = vmand %vm356_vm8, %vm2649_vm2  ;;  %vm510_vm11 = vcmp.eq.s32.totalorder %v1927_v23, %v1770_v7  ;;  %vm505_vm8 = vcmp.eq.s32.totalorder %v463_v60, %v1770_v7  ;;  %vm512_vm2 = vcmp.eq.s32.totalorder %v1938_v26, %v1770_v7 }
 0x1f2   :  { %v490_v50 = vpop.permute.xlu0 %489  ;;  %v2277_v24 = vmul.f32 %v1337_v21, %v1969_v36  ;;  %vm526_vm3 = vmand %vm510_vm11, %vm2240_vm15  ;;  %vm2710_vm11 = vcmp.lt.s32.totalorder %v1760_v5, 16 }
 0x1f3   :  { %vm514_vm6 = vcmp.eq.s32.totalorder %v490_v50, %v1770_v7 }
 0x1f4   :  { %1056 = vadd.xlane.f32.xlu0 %v1983_v42  ;;  %vm530_vm5 = vmand %vm514_vm6, %vm2264_vm7 }
 0x1f5   :  { %v1340_v51 = vsel %vm530_vm5, 1.0, %v2690_v20  ;;  %vm351_vm5 = vcmp.ne.s32.totalorder %v332_v47, %v1760_v5  ;;  %vm521_vm7 = vmand %vm505_vm8, %vm2303_vm0  ;;  %v2745_v47 = vsub.f32 %v2047_v15, %v2061_v31  ;;  %v2752_v15 = vld [vmem:[#allocation14_spill] sm:$0xff]  ;;  %v2753_v31 = vld [vmem:[#allocation16_spill] sm:$0xff] }
 0x1f6   :  { %v493_v50 = vpop.permute.xlu0 %492  ;;  %v2308_v42 = vmul.f32 %v1980_v40, %v1340_v51  ;;  %vm2331_vm4 = vmand %vm351_vm5, %vm2710_vm11  ;;  %v1331_v26 = vsel %vm521_vm7, 1.0, %v2690_v20 }
 0x1f7   :  { %vm515_vm6 = vcmp.eq.s32.totalorder %v493_v50, %v1770_v7  ;;  %v2339_v50 = vsel %vm526_vm3, 1.0, %v2690_v20  ;;  %vm528_vm8 = vmand %vm512_vm2, %vm2283_vm14  ;;  %vm357_vm3 = vcmp.ne.s32.totalorder %v338_v18, %v1760_v5  ;;  %vm513_vm2 = vcmp.eq.s32.totalorder %v1976_v38, %v1770_v7 }
 0x1f8   :  { %1060 = vadd.xlane.f32.xlu0 %v2314_v41  ;;  %vm531_vm13 = vmand %vm515_vm6, %vm2296_vm12  ;;  %v2348_v6 = vsel %vm528_vm8, 1.0, %v2690_v20  ;;  %v950_v5 = vmul.f32 %v1792_v13, %v1951_v30  ;;  %v952_v7 = vmul.f32 %v1803_v16, %v1967_v35  ;;  %v954_v17 = vmul.f32 %v1331_v26, %v1989_v44 }
 0x1f9   :  { %v1341_v58 = vsel %vm531_vm13, 1.0, %v2690_v20  ;;  %vm523_vm6 = vmand %vm507_vm9, %vm2331_vm4  ;;  %vm2720_vm9 = vnez %v2655_v8  ;;  %vm2724_vm8 = vnez %v2699_v46 }
 0x1fa   :  { %v2336_v60 = vmul.f32 %v1341_v58, %v2003_v53  ;;  %vm2714_vm7 = vmmov %vm2710_vm11  ;;  %vm2722_vm11 = vnez %v2663_v32  ;;  %v1317_v32 = vsel %vm2724_vm8, 1.0, %v2690_v20 }
 0x1fb   :  { %vm2358_vm5 = vmand %vm357_vm3, %vm2714_vm7  ;;  %v1315_v8 = vsel %vm2722_vm11, 1.0, %v2690_v20 }
 0x1fc   :  { %2713 = vst [vmem:[#allocation35_spill] sm:$0xff] %v2336_v60  ;;  %1064 = vadd.xlane.f32.xlu0 %v2339_v50  ;;  %v1333_v60 = vsel %vm523_vm6, 1.0, %v2690_v20  ;;  %vm529_vm13 = vmand %vm513_vm2, %vm2358_vm5  ;;  %v1322_v23 = vsel %vm2358_vm5, 1.0, %v2690_v20  ;;  %vm2725_vm6 = vcmask 7168  }
 0x1fd   :  { %1054 = vadd.xlane.f32.xlu1 %v1331_v26  ;;  %v2368_v18 = vsel %vm529_vm13, 1.0, %v2690_v20  ;;  %v956_v38 = vmul.f32 %v1333_v60, %v2001_v52  ;;  %vm2726_vm3 = vmmov %vm2725_vm6 }
 0x1fe   :  { %vm2727_vm2 = vmmov %vm2726_vm3 }
 0x1ff   :  { %vm2728_vm7 = vmmov %vm2727_vm2 }
 0x200   :  { %1068 = vadd.xlane.f32.xlu0 %v2348_v6  ;;  %vm2729_vm5 = vmmov %vm2727_vm2 }
 0x201   :  { %1058 = vadd.xlane.f32.xlu1 %v1333_v60  ;;  %vm2730_vm13 = vmmov %vm2727_vm2 }
 0x204   :  { %1072 = vadd.xlane.f32.xlu0 %v1340_v51 }
 0x205   :  { %1062 = vadd.xlane.f32.xlu1 %v1335_v63 }
 0x208   :  { %1076 = vadd.xlane.f32.xlu0 %v2195_v55 }
 0x209   :  { %1066 = vadd.xlane.f32.xlu1 %v1337_v21 }
 0x20c   :  { %968 = vadd.xlane.f32.xlu0 %v951_v3 }
 0x20d   :  { %1070 = vadd.xlane.f32.xlu1 %v2368_v18 }
 0x210   :  { %972 = vadd.xlane.f32.xlu0 %v1974_v37 }
 0x211   :  { %1074 = vadd.xlane.f32.xlu1 %v1341_v58 }
 0x214   :  { %976 = vadd.xlane.f32.xlu0 %v1993_v45 }
 0x215   :  { %966 = vadd.xlane.f32.xlu1 %v950_v5 }
 0x219   :  { %970 = vadd.xlane.f32.xlu1 %v952_v7 }
 0x21d   :  { %974 = vadd.xlane.f32.xlu1 %v954_v17 }
 0x221   :  { %978 = vadd.xlane.f32.xlu1 %v956_v38 }
 0x22a   :  { %709 = vperm.xlu0 %1485, %v2143_v54  }
 0x22e   :  { %749 = vperm.xlu0 %1485, %v2162_v22  }
 0x238   :  { %v685_v37 = vpop.permute.xlu1 %684 }
 0x239   :  { %v758_v13 = vsub.f32 %v1943_v27, %v685_v37  ;;  %v1311_v27 = vsel %vm1796_vm10, 1.0, %v2690_v20  ;;  %vm2717_vm10 = vnez %v2657_v10 }
 0x23b   :  { %v775_v55 = vmul.f32 1.442695, %v758_v13 }
 0x23c   :  { %v720_v45 = vpop.permute.xlu0 %719  ;;  %v725_v63 = vpop.permute.xlu1 %724 }
 0x23d   :  { %1487 = vpow2.f32 %v775_v55  ;;  %v765_v16 = vsub.f32 %v1948_v29, %v720_v45  ;;  %v766_v21 = vsub.f32 %v1945_v28, %v725_v63 }
 0x23f   :  { %v789_v51 = vmul.f32 1.442695, %v765_v16  ;;  %v791_v58 = vmul.f32 1.442695, %v766_v21 }
 0x240   :  { %v680_v26 = vpop.permute.xlu1 %679 }
 0x241   :  { %1489 = vpow2.f32 %v789_v51  ;;  %v757_v60 = vsub.f32 %v1951_v30, %v680_v26  ;;  %v1318_v30 = vsel %vm2219_vm1, 1.0, %v2690_v20  ;;  %v1319_v26 = vsel %vm2240_vm15, 1.0, %v2690_v20 }
 0x242   :  { %1491 = vpow2.f32 %v791_v58  ;;  %vm2718_vm1 = vnez %v2661_v25  ;;  %vm2719_vm15 = vnez %v2695_v56 }
 0x243   :  { %v773_v3 = vmul.f32 1.442695, %v757_v60  ;;  %v1320_v25 = vsel %vm2719_vm15, 1.0, %v2690_v20 }
 0x244   :  { %v695_v5 = vpop.permute.xlu1 %694 }
 0x245   :  { %v760_v7 = vsub.f32 %v1961_v33, %v695_v5  ;;  %1493 = vpow2.f32 %v773_v3 }
 0x247   :  { %v1488_v17 = vpop.eup %1487  ;;  %v779_v29 = vmul.f32 1.442695, %v760_v7 }
 0x248   :  { %v690_v38 = vpop.permute.xlu0 %689  ;;  %v735_v37 = vpop.permute.xlu1 %734  ;;  %v806_v13 = vmul.f32 %v1488_v17, %v1311_v27 }
 0x249   :  { %v768_v55 = vsub.f32 %v1963_v34, %v735_v37  ;;  %1495 = vpow2.f32 %v779_v29  ;;  %v759_v45 = vsub.f32 %v1967_v35, %v690_v38  ;;  %v1310_v29 = vsel %vm2717_vm10, 1.0, %v2690_v20  ;;  %vm2731_vm10 = vmmov %vm2727_vm2 }
 0x24a   :  { %855 = vadd.xlane.f32.xlu1 %v806_v13 }
 0x24b   :  { %v1490_v33 = vpop.eup %1489  ;;  %v795_v63 = vmul.f32 1.442695, %v768_v55  ;;  %v777_v35 = vmul.f32 1.442695, %v759_v45  ;;  %v1313_v45 = vsel %vm2718_vm1, 1.0, %v2690_v20  ;;  %vm2732_vm1 = vmmov %vm2727_vm2 }
 0x24c   :  { %v1492_v16 = vpop.eup %1491  ;;  %v730_v21 = vpop.permute.xlu0 %729  ;;  %v813_v58 = vmul.f32 %v1490_v33, %v1318_v30  ;;  %vm2733_vm15 = vmmov %vm2732_vm1 }
 0x24d   :  { %v705_v51 = vpop.permute.xlu1 %704  ;;  %v767_v4 = vsub.f32 %v1969_v36, %v730_v21  ;;  %980 = vadd.xlane.f32.xlu0 %v957_v14  ;;  %1497 = vpow2.f32 %v795_v63  ;;  %v814_v5 = vmul.f32 %v1492_v16, %v1319_v26  ;;  %v1321_v16 = vsel %vm2283_vm14, 1.0, %v2690_v20  ;;  %vm2736_vm11 = vmmov %vm2732_vm1 }
 0x24e   :  { %v762_v60 = vsub.f32 %v1978_v39, %v705_v51  ;;  %869 = vadd.xlane.f32.xlu1 %v813_v58  ;;  %vm2721_vm14 = vnez %v2701_v59 }
 0x24f   :  { %v793_v3 = vmul.f32 1.442695, %v767_v4  ;;  %v1494_v7 = vpop.eup %1493  ;;  %v1323_v56 = vsel %vm2721_vm14, 1.0, %v2690_v20  ;;  %vm2735_vm14 = vmmov %vm2732_vm1 }
 0x250   :  { %v783_v41 = vmul.f32 1.442695, %v762_v60  ;;  %v700_v27 = vpop.permute.xlu0 %699  ;;  %v805_v37 = vmul.f32 %v1494_v7, %v1310_v29 }
 0x251   :  { %v745_v17 = vpop.permute.xlu1 %744  ;;  %1499 = vpow2.f32 %v793_v3  ;;  %v761_v61 = vsub.f32 %v1989_v44, %v700_v27  ;;  %871 = vadd.xlane.f32.xlu0 %v814_v5 }
 0x252   :  { %v770_v36 = vsub.f32 %v1980_v40, %v745_v17  ;;  %1501 = vpow2.f32 %v777_v35  ;;  %v1312_v35 = vsel %vm2720_vm9, 1.0, %v2690_v20  ;;  %vm2734_vm9 = vmmov %vm2732_vm1 }
 0x253   :  { %v781_v39 = vmul.f32 1.442695, %v761_v61  ;;  %v1496_v13 = vpop.eup %1495  ;;  %1503 = vpow2.f32 %v783_v41 }
 0x254   :  { %v799_v38 = vmul.f32 1.442695, %v770_v36  ;;  %v740_v55 = vpop.permute.xlu0 %739  ;;  %v808_v33 = vmul.f32 %v1496_v13, %v1313_v45  ;;  %v1035_v13 = vld [vmem:[#allocation6 + $0x28] sm:$0xff] }
 0x255   :  { %v715_v30 = vpop.permute.xlu1 %714  ;;  %1505 = vpow2.f32 %v781_v39  ;;  %v769_v10 = vsub.f32 %v1985_v43, %v740_v55  ;;  %853 = vadd.xlane.f32.xlu0 %v805_v37  ;;  %v959_v37 = vmul.f32 %v1945_v28, %v2339_v50  ;;  %v1034_v28 = vld [vmem:[#allocation6 + $0x20] sm:$0xff] }
 0x256   :  { %1507 = vpow2.f32 %v799_v38  ;;  %v764_v40 = vsub.f32 %v1995_v48, %v715_v30  ;;  %v1037_v30 = vld [vmem:[#allocation6 + $0x38] sm:$0xff] }
 0x257   :  { %v797_v44 = vmul.f32 1.442695, %v769_v10  ;;  %v1498_v63 = vpop.eup %1497 }
 0x258   :  { %v787_v51 = vmul.f32 1.442695, %v764_v40  ;;  %v816_v48 = vmul.f32 %v1498_v63, %v1321_v16  ;;  %v1039_v40 = vld [vmem:[#allocation6 + $0x48] sm:$0xff] }
 0x259   :  { %v755_v14 = vpop.permute.xlu1 %754  ;;  %1509 = vpow2.f32 %v797_v44  ;;  %859 = vadd.xlane.f32.xlu0 %v808_v33  ;;  %v1041_v33 = vld [vmem:[#allocation6 + $0x58] sm:$0xff] }
 0x25a   :  { %v772_v21 = vsub.f32 %v1997_v49, %v755_v14  ;;  %v1314_v49 = vsel %vm2303_vm0, 1.0, %v2690_v20  ;;  %vm2723_vm0 = vnez %v2687_v19  ;;  %v961_v19 = vmul.f32 %v1963_v34, %v2348_v6 }
 0x25b   :  { %v1500_v58 = vpop.eup %1499  ;;  %v1325_v59 = vsel %vm2723_vm0, 1.0, %v2690_v20  ;;  %vm2737_vm0 = vmmov %vm2732_vm1 }
 0x25c   :  { %v803_v26 = vmul.f32 1.442695, %v772_v21  ;;  %v1502_v4 = vpop.eup %1501  ;;  %v815_v60 = vmul.f32 %v1500_v58, %v1320_v25  ;;  %v1043_v21 = vld [vmem:[#allocation6 + $0x68] sm:$0xff]  ;;  %v1038_v25 = vld [vmem:[#allocation6 + $0x40] sm:$0xff]  ;;  %vm2738_vm8 = vmmov %vm2737_vm0 }
 0x25d   :  { %875 = vadd.xlane.f32.xlu0 %v816_v48  ;;  %v1504_v57 = vpop.eup %1503  ;;  %v807_v5 = vmul.f32 %v1502_v4, %v1312_v35  ;;  %v1045_v4 = vld [vmem:[#allocation6 + $0x78] sm:$0xff] }
 0x25e   :  { %1511 = vpow2.f32 %v803_v26  ;;  %873 = vadd.xlane.f32.xlu1 %v815_v60  ;;  %v810_v29 = vmul.f32 %v1504_v57, %v1315_v8  ;;  %v1040_v60 = vld [vmem:[#allocation6 + $0x50] sm:$0xff] }
 0x25f   :  { %1513 = vpow2.f32 %v787_v51  ;;  %v1506_v3 = vpop.eup %1505 }
 0x260   :  { %v1508_v7 = vpop.eup %1507  ;;  %v809_v41 = vmul.f32 %v1506_v3, %v1314_v49  ;;  %v935_v3 = vld [vmem:[#allocation5 + $0x8] sm:$0xff] }
 0x261   :  { %857 = vadd.xlane.f32.xlu0 %v807_v5  ;;  %v818_v27 = vmul.f32 %v1508_v7, %v1323_v56  ;;  %v1042_v5 = vld [vmem:[#allocation6 + $0x60] sm:$0xff] }
 0x262   :  { %861 = vadd.xlane.f32.xlu1 %v809_v41 }
 0x263   :  { %v1510_v17 = vpop.eup %1509 }
 0x264   :  { %v817_v61 = vmul.f32 %v1510_v17, %v1322_v23  ;;  %v1044_v17 = vld [vmem:[#allocation6 + $0x70] sm:$0xff] }
 0x265   :  { %863 = vadd.xlane.f32.xlu0 %v810_v29 }
 0x266   :  { %877 = vadd.xlane.f32.xlu1 %v817_v61 }
 0x268   :  { %v1512_v36 = vpop.eup %1511 }
 0x269   :  { %v1514_v39 = vpop.eup %1513  ;;  %v820_v38 = vmul.f32 %v1512_v36, %v1325_v59  ;;  %879 = vadd.xlane.f32.xlu0 %v818_v27  ;;  %v937_v27 = vld [vmem:[#allocation5 + $0x18] sm:$0xff] }
 0x26a   :  { %v812_v9 = vmul.f32 %v1514_v39, %v1317_v32  ;;  %v939_v39 = vld [vmem:[#allocation5 + $0x28] sm:$0xff]  ;;  %v934_v32 = vld [vmem:[#allocation5] sm:$0xff] }
 0x26d   :  { %867 = vadd.xlane.f32.xlu0 %v812_v9 }
 0x271   :  { %883 = vadd.xlane.f32.xlu0 %v820_v38 }
 0x275   :  { %984 = vadd.xlane.f32.xlu0 %v959_v37 }
 0x279   :  { %988 = vadd.xlane.f32.xlu0 %v961_v19 }
 0x27d   :  { %992 = vadd.xlane.f32.xlu0 %v2308_v42  ;;  %v1036_v42 = vld [vmem:[#allocation6 + $0x30] sm:$0xff] }
 0x281   :  { %v1057_v55 = vpop.xlane.xlu0 %1056  ;;  %996 = vadd.xlane.f32.xlu0 %v2199_v62 }
 0x282   :  { %v1083_v46 = vadd.f32 %v1057_v55, %v1035_v13  ;;  %v936_v13 = vld [vmem:[#allocation5 + $0x10] sm:$0xff] }
 0x284   :  { %1099 = vst.msk [vmem:[#allocation6 + $0x28] sm:$0xff] %vm2725_vm6, %v1083_v46  ;;  %vm2739_vm6 = vmmov %vm2737_vm0 }
 0x285   :  { %v1061_v45 = vpop.xlane.xlu0 %1060 }
 0x286   :  { %v1085_v10 = vadd.f32 %v1061_v45, %v1037_v30  ;;  %v938_v30 = vld [vmem:[#allocation5 + $0x20] sm:$0xff] }
 0x288   :  { %1101 = vst.msk [vmem:[#allocation6 + $0x38] sm:$0xff] %vm2726_vm3, %v1085_v10  ;;  %vm2740_vm3 = vmmov %vm2737_vm0 }
 0x289   :  { %v1065_v50 = vpop.xlane.xlu0 %1064 }
 0x28a   :  { %v1087_v44 = vadd.f32 %v1065_v50, %v1039_v40  ;;  %v1055_v34 = vpop.xlane.xlu1 %1054 }
 0x28b   :  { %v1082_v6 = vadd.f32 %v1055_v34, %v1034_v28 }
 0x28c   :  { %1103 = vst.msk [vmem:[#allocation6 + $0x48] sm:$0xff] %vm2727_vm2, %v1087_v44  ;;  %vm2741_vm2 = vmmov %vm2737_vm0  ;;  %v940_v44 = vld [vmem:[#allocation5 + $0x30] sm:$0xff] }
 0x28d   :  { %1098 = vst.msk [vmem:[#allocation6 + $0x20] sm:$0xff] %vm2728_vm7, %v1082_v6  ;;  %v1069_v62 = vpop.xlane.xlu0 %1068  ;;  %vm2742_vm7 = vmmov %vm2737_vm0 }
 0x28e   :  { %v1089_v63 = vadd.f32 %v1069_v62, %v1041_v33  ;;  %v1059_v14 = vpop.xlane.xlu1 %1058 }
 0x28f   :  { %v1084_v16 = vadd.f32 %v1059_v14, %v1036_v42 }
 0x290   :  { %1105 = vst.msk [vmem:[#allocation6 + $0x58] sm:$0xff] %vm2729_vm5, %v1089_v63  ;;  %vm2743_vm5 = vmmov %vm2737_vm0 }
 0x291   :  { %1100 = vst.msk [vmem:[#allocation6 + $0x30] sm:$0xff] %vm2730_vm13, %v1084_v16  ;;  %v1073_v51 = vpop.xlane.xlu0 %1072  ;;  %v1324_v16 = vsel %vm2296_vm12, 1.0, %v2690_v20  ;;  %vm2768_vm12 = vmmov %vm2737_vm0 }
 0x292   :  { %v1091_v58 = vadd.f32 %v1073_v51, %v1043_v21  ;;  %v1063_v26 = vpop.xlane.xlu1 %1062  ;;  %vm2769_vm13 = vmmov %vm2737_vm0 }
 0x293   :  { %v1086_v48 = vadd.f32 %v1063_v26, %v1038_v25  ;;  %v2747_v26 = vsub.f32 %v2037_v1, %v2746_v0  ;;  %v829_v1 = vld [vmem:[#allocation4 + $0x40] sm:$0xff] }
 0x294   :  { %1107 = vst.msk [vmem:[#allocation6 + $0x68] sm:$0xff] %vm2731_vm10, %v1091_v58  ;;  %v661_v58 = vmul.f32 1.442695, %v2745_v47  ;;  %vm2776_vm10 = vmmov %vm2737_vm0 }
 0x295   :  { %1102 = vst.msk [vmem:[#allocation6 + $0x40] sm:$0xff] %vm2732_vm1, %v1086_v48  ;;  %v1077_v35 = vpop.xlane.xlu0 %1076  ;;  %v663_v48 = vmul.f32 1.442695, %v2747_v26  ;;  %v2777_v26 = vld [vmem:[#allocation28_spill] sm:$0xff]  ;;  %vm2780_vm1 = vmmov %vm2737_vm0 }
 0x296   :  { %v1093_v49 = vadd.f32 %v1077_v35, %v1045_v4  ;;  %v1067_v57 = vpop.xlane.xlu1 %1066  ;;  %v822_v35 = vld [vmem:[#allocation4 + $0x8] sm:$0xff] }
 0x297   :  { %v1088_v56 = vadd.f32 %v1067_v57, %v1040_v60 }
 0x298   :  { %1109 = vst.msk [vmem:[#allocation6 + $0x78] sm:$0xff] %vm2733_vm15, %v1093_v49  ;;  %v2754_v49 = vsub.f32 %v2752_v15, %v2753_v31  ;;  %v831_v31 = vld [vmem:[#allocation4 + $0x50] sm:$0xff]  ;;  %vm2784_vm15 = vmmov %vm2737_vm0 }
 0x299   :  { %1104 = vst.msk [vmem:[#allocation6 + $0x50] sm:$0xff] %vm2734_vm9, %v1088_v56  ;;  %v969_v7 = vpop.xlane.xlu0 %968  ;;  %vm2788_vm9 = vmmov %vm2737_vm0 }
 0x29a   :  { %v999_v41 = vadd.f32 %v969_v7, %v935_v3  ;;  %v1071_v8 = vpop.xlane.xlu1 %1070  ;;  %v2755_v3 = vld [vmem:[#allocation17_spill] sm:$0xff] }
 0x29b   :  { %v1090_v23 = vadd.f32 %v1071_v8, %v1042_v5  ;;  %v2756_v5 = vld [vmem:[#allocation19_spill] sm:$0xff] }
 0x29c   :  { %1015 = vst.msk [vmem:[#allocation5 + $0x8] sm:$0xff] %vm2735_vm14, %v999_v41  ;;  %v2757_v7 = vsub.f32 %v2755_v3, %v2756_v5  ;;  %vm2789_vm14 = vmmov %vm2737_vm0 }
 0x29d   :  { %1106 = vst.msk [vmem:[#allocation6 + $0x60] sm:$0xff] %vm2736_vm11, %v1090_v23  ;;  %v973_v29 = vpop.xlane.xlu0 %972  ;;  %v941_v23 = vld [vmem:[#allocation5 + $0x38] sm:$0xff]  ;;  %vm2790_vm11 = vmmov %vm2737_vm0 }
 0x29e   :  { %v1001_v61 = vadd.f32 %v973_v29, %v937_v27  ;;  %v1075_v59 = vpop.xlane.xlu1 %1074  ;;  %v667_v41 = vmul.f32 1.442695, %v2757_v7  ;;  %v2758_v27 = vld [vmem:[#allocation13_spill] sm:$0xff]  ;;  %v823_v7 = vld [vmem:[#allocation4 + $0x10] sm:$0xff] }
 0x29f   :  { %v1092_v36 = vadd.f32 %v1075_v59, %v1044_v17  ;;  %v2759_v17 = vld [vmem:[#allocation15_spill] sm:$0xff] }
 0x2a0   :  { %1017 = vst.msk [vmem:[#allocation5 + $0x18] sm:$0xff] %vm2737_vm0, %v1001_v61  ;;  %v2760_v29 = vsub.f32 %v2758_v27, %v2759_v17  ;;  %v825_v27 = vld [vmem:[#allocation4 + $0x20] sm:$0xff] }
 0x2a1   :  { %1108 = vst.msk [vmem:[#allocation6 + $0x70] sm:$0xff] %vm2738_vm8, %v1092_v36  ;;  %v977_v38 = vpop.xlane.xlu0 %976  ;;  %vm2791_vm8 = vmmov %vm2737_vm0 }
 0x2a2   :  { %v1003_v9 = vadd.f32 %v977_v38, %v939_v39  ;;  %v967_v37 = vpop.xlane.xlu1 %966  ;;  %v665_v61 = vmul.f32 1.442695, %v2760_v29  ;;  %v1209_v29 = vld [vmem:[#allocation6] sm:$0xff] }
 0x2a3   :  { %v998_v19 = vadd.f32 %v967_v37, %v934_v32  ;;  %v830_v32 = vld [vmem:[#allocation4 + $0x48] sm:$0xff]  ;;  %v2762_v37 = vld [vmem:[#allocation21_spill] sm:$0xff] }
 0x2a4   :  { %1019 = vst.msk [vmem:[#allocation5 + $0x28] sm:$0xff] %vm2739_vm6, %v1003_v9  ;;  %vm2792_vm6 = vmmov %vm2737_vm0 }
 0x2a5   :  { %1014 = vst.msk [vmem:[#allocation5] sm:$0xff] %vm2740_vm3, %v998_v19  ;;  %v2763_v19 = vld [vmem:[#allocation23_spill] sm:$0xff]  ;;  %vm2793_vm3 = vmmov %vm2737_vm0 }
 0x2a6   :  { %v971_v55 = vpop.xlane.xlu1 %970 }
 0x2a7   :  { %v1000_v46 = vadd.f32 %v971_v55, %v936_v13  ;;  %v2764_v13 = vsub.f32 %v2762_v37, %v2763_v19 }
 0x2a9   :  { %1016 = vst.msk [vmem:[#allocation5 + $0x10] sm:$0xff] %vm2741_vm2, %v1000_v46  ;;  %v710_v45 = vpop.permute.xlu0 %709  ;;  %v649_v55 = vmul.f32 1.442695, %v2764_v13  ;;  %vm2794_vm2 = vmmov %vm2737_vm0 }
 0x2aa   :  { %v763_v10 = vsub.f32 %v2001_v52, %v710_v45  ;;  %v975_v40 = vpop.xlane.xlu1 %974  ;;  %v1316_v52 = vsel %vm2331_vm4, 1.0, %v2690_v20  ;;  %v962_v20 = vmul.f32 %v2368_v18, %v1985_v43  ;;  %v651_v43 = vmul.f32 1.442695, %v2754_v49  ;;  %vm2761_vm4 = vmmov %vm2737_vm0  ;;  %v2766_v45 = vld [vmem:[#allocation20_spill] sm:$0xff]  ;;  %v2781_v49 = vld [vmem:[#allocation31_spill] sm:$0xff] }
 0x2ab   :  { %v1002_v28 = vadd.f32 %v975_v40, %v938_v30  ;;  %v2765_v30 = vld [vmem:[#allocation18_spill] sm:$0xff] }
 0x2ac   :  { %v785_v50 = vmul.f32 1.442695, %v763_v10  ;;  %v2767_v10 = vsub.f32 %v2765_v30, %v2766_v45 }
 0x2ad   :  { %1018 = vst.msk [vmem:[#allocation5 + $0x20] sm:$0xff] %vm2742_vm7, %v1002_v28  ;;  %v750_v34 = vpop.permute.xlu0 %749  ;;  %vm2795_vm7 = vmmov %vm2737_vm0 }
 0x2ae   :  { %1515 = vpow2.f32 %v785_v50  ;;  %v771_v6 = vsub.f32 %v2003_v53, %v750_v34  ;;  %v979_v33 = vpop.xlane.xlu1 %978  ;;  %v2744_v53 = vsub.f32 %v2039_v2, %v2045_v11  ;;  %v2749_v2 = vld [vmem:[#allocation11_spill] sm:$0xff]  ;;  %v2750_v11 = vld [vmem:[#allocation12_spill] sm:$0xff]  ;;  %v653_v40 = vmul.f32 1.442695, %v2767_v10  ;;  %v821_v34 = vld [vmem:[#allocation4] sm:$0xff] }
 0x2af   :  { %v1004_v42 = vadd.f32 %v979_v33, %v940_v44  ;;  %v1210_v33 = vld [vmem:[#allocation6 + $0x8] sm:$0xff] }
 0x2b0   :  { %v801_v62 = vmul.f32 1.442695, %v771_v6  ;;  %v647_v51 = vmul.f32 1.442695, %v2744_v53  ;;  %v826_v10 = vld [vmem:[#allocation4 + $0x28] sm:$0xff] }
 0x2b1   :  { %1020 = vst.msk [vmem:[#allocation5 + $0x30] sm:$0xff] %vm2743_vm5, %v1004_v42  ;;  %v2770_v42 = vld [vmem:[#allocation25_spill] sm:$0xff]  ;;  %vm2796_vm5 = vmmov %vm2737_vm0 }
 0x2b2   :  { %1517 = vpow2.f32 %v801_v62  ;;  %v2771_v62 = vld [vmem:[#allocation27_spill] sm:$0xff] }
 0x2b3   :  { %1519 = vpow2.f32 %v647_v51 }
 0x2b4   :  { %1521 = vpow2.f32 %v661_v58 }
 0x2b5   :  { %1523 = vpow2.f32 %v663_v48  ;;  %v2778_v48 = vld [vmem:[#allocation30_spill] sm:$0xff] }
 0x2b8   :  { %v1516_v63 = vpop.eup %1515 }
 0x2b9   :  { %v811_v14 = vmul.f32 %v1516_v63, %v1316_v52  ;;  %v2772_v52 = vsub.f32 %v2770_v42, %v2771_v62 }
 0x2bb   :  { %865 = vadd.xlane.f32.xlu1 %v811_v14  ;;  %v655_v63 = vmul.f32 1.442695, %v2772_v52  ;;  %v2773_v14 = vld [vmem:[#allocation22_spill] sm:$0xff] }
 0x2bc   :  { %v1518_v21 = vpop.eup %1517 }
 0x2bd   :  { %v819_v25 = vmul.f32 %v1518_v21, %v1324_v16  ;;  %v1520_v60 = vpop.eup %1519  ;;  %v2774_v16 = vld [vmem:[#allocation24_spill] sm:$0xff] }
 0x2be   :  { %v838_v18 = vmul.f32 %v1520_v60, %v822_v35  ;;  %v1522_v57 = vpop.eup %1521  ;;  %v2775_v21 = vsub.f32 %v2773_v14, %v2774_v16  ;;  %v832_v60 = vld [vmem:[#allocation4 + $0x58] sm:$0xff] }
 0x2bf   :  { %881 = vadd.xlane.f32.xlu1 %v819_v25  ;;  %v1524_v59 = vpop.eup %1523  ;;  %v845_v39 = vmul.f32 %v1522_v57, %v829_v1 }
 0x2c0   :  { %v846_v28 = vmul.f32 %v1524_v59, %v830_v32  ;;  %v669_v25 = vmul.f32 1.442695, %v2775_v21  ;;  %v2786_v59 = vld [vmem:[#allocation34_spill] sm:$0xff]  ;;  %v1194_v32 = vld [vmem:[#allocation5 + $0x8] sm:$0xff] }
 0x2c3   :  { %982 = vadd.xlane.f32.xlu1 %v2247_v12  ;;  %v2748_v12 = vld [vmem:[#allocation35_spill] sm:$0xff] }
 0x2c7   :  { %986 = vadd.xlane.f32.xlu1 %v2277_v24  ;;  %v2751_v24 = vsub.f32 %v2749_v2, %v2750_v11 }
 0x2c9   :  { %v645_v4 = vmul.f32 1.442695, %v2751_v24 }
 0x2cb   :  { %990 = vadd.xlane.f32.xlu1 %v962_v20  ;;  %1525 = vpow2.f32 %v645_v4  ;;  %v824_v20 = vld [vmem:[#allocation4 + $0x18] sm:$0xff] }
 0x2cc   :  { %1527 = vpow2.f32 %v651_v43  ;;  %v2782_v43 = vld [vmem:[#allocation32_spill] sm:$0xff] }
 0x2cd   :  { %1529 = vpow2.f32 %v667_v41 }
 0x2ce   :  { %1531 = vpow2.f32 %v665_v61  ;;  %v2785_v61 = vld [vmem:[#allocation33_spill] sm:$0xff] }
 0x2cf   :  { %994 = vadd.xlane.f32.xlu1 %v2748_v12  ;;  %1533 = vpow2.f32 %v649_v55  ;;  %v2779_v12 = vsub.f32 %v2777_v26, %v2778_v48 }
 0x2d0   :  { %1535 = vpow2.f32 %v653_v40 }
 0x2d1   :  { %v671_v2 = vmul.f32 1.442695, %v2779_v12  ;;  %v828_v12 = vld [vmem:[#allocation4 + $0x38] sm:$0xff] }
 0x2d5   :  { %v1526_v50 = vpop.eup %1525 }
 0x2d6   :  { %v837_v51 = vmul.f32 %v1526_v50, %v821_v34  ;;  %v1528_v47 = vpop.eup %1527 }
 0x2d7   :  { %v856_v56 = vpop.xlane.xlu1 %855  ;;  %v840_v11 = vmul.f32 %v1528_v47, %v824_v20  ;;  %v1530_v24 = vpop.eup %1529  ;;  %v1211_v20 = vld [vmem:[#allocation6 + $0x10] sm:$0xff] }
 0x2d8   :  { %v886_v8 = vadd.f32 %v856_v56, %v838_v18  ;;  %v1532_v35 = vpop.eup %1531  ;;  %v2783_v18 = vsub.f32 %v2781_v49, %v2782_v43  ;;  %v848_v56 = vmul.f32 %v1530_v24, %v832_v60 }
 0x2d9   :  { %v1534_v1 = vpop.eup %1533  ;;  %v847_v5 = vmul.f32 %v1532_v35, %v831_v31  ;;  %v1113_v31 = vld [vmem:[#allocation3] sm:$0xff] }
 0x2da   :  { %903 = vst.msk [vmem:[#allocation4 + $0x8] sm:$0xff] %vm2761_vm4, %v886_v8  ;;  %v981_v36 = vpop.xlane.xlu0 %980  ;;  %v659_v57 = vmul.f32 1.442695, %v2783_v18  ;;  %v1536_v41 = vpop.eup %1535  ;;  %v839_v13 = vmul.f32 %v1534_v1, %v823_v7  ;;  %vm2797_vm4 = vmmov %vm2737_vm0 }
 0x2db   :  { %v1005_v38 = vadd.f32 %v981_v36, %v941_v23  ;;  %v870_v9 = vpop.xlane.xlu1 %869  ;;  %v2787_v36 = vsub.f32 %v2785_v61, %v2786_v59  ;;  %v841_v45 = vmul.f32 %v1536_v41, %v825_v27  ;;  %v1196_v41 = vld [vmem:[#allocation5 + $0x18] sm:$0xff] }
 0x2dc   :  { %v893_v46 = vadd.f32 %v870_v9, %v845_v39  ;;  %v1116_v59 = vld [vmem:[#allocation3 + $0x18] sm:$0xff] }
 0x2dd   :  { %1021 = vst.msk [vmem:[#allocation5 + $0x38] sm:$0xff] %vm2768_vm12, %v1005_v38  ;;  %v675_v39 = vmul.f32 1.442695, %v2787_v36  ;;  %vm2798_vm12 = vmmov %vm2737_vm0 }
 0x2de   :  { %910 = vst.msk [vmem:[#allocation4 + $0x40] sm:$0xff] %vm2769_vm13, %v893_v46  ;;  %v872_v44 = vpop.xlane.xlu0 %871  ;;  %v1114_v46 = vld [vmem:[#allocation3 + $0x8] sm:$0xff]  ;;  %vm2799_vm13 = vmmov %vm2737_vm0 }
 0x2df   :  { %v894_v6 = vadd.f32 %v872_v44, %v846_v28 }
 0x2e1   :  { %v1130_v53 = vld [vmem:[#allocation4 + $0x8] sm:$0xff]  ;;  %911 = vst.msk [vmem:[#allocation4 + $0x48] sm:$0xff] %vm2776_vm10, %v894_v6  ;;  %v833_v6 = vld [vmem:[#allocation4 + $0x60] sm:$0xff]  ;;  %vm2800_vm10 = vmmov %vm2737_vm0 }
 0x2e2   :  { %1537 = vlog2.f32 %v1130_v53  ;;  %v854_v58 = vpop.xlane.xlu0 %853 }
 0x2e3   :  { %1539 = vrcp.f32 %v1210_v33  ;;  %v885_v0 = vadd.f32 %v854_v58, %v837_v51  ;;  %v1212_v33 = vld [vmem:[#allocation6 + $0x18] sm:$0xff] }
 0x2e4   :  { %1541 = vpow2.f32 %v655_v63 }
 0x2e5   :  { %1543 = vpow2.f32 %v669_v25  ;;  %902 = vst.msk [vmem:[#allocation4] sm:$0xff] %vm2780_vm1, %v885_v0  ;;  %v834_v25 = vld [vmem:[#allocation4 + $0x68] sm:$0xff]  ;;  %vm2801_vm1 = vmmov %vm2737_vm0 }
 0x2e6   :  { %v860_v4 = vpop.xlane.xlu0 %859  ;;  %1545 = vpow2.f32 %v671_v2 }
 0x2e7   :  { %v888_v15 = vadd.f32 %v860_v4, %v840_v11  ;;  %1547 = vpow2.f32 %v659_v57  ;;  %v1193_v11 = vld [vmem:[#allocation5] sm:$0xff] }
 0x2e8   :  { %v1213_v4 = vld [vmem:[#allocation6 + $0x20] sm:$0xff]  ;;  %v1138_v49 = vld [vmem:[#allocation4 + $0x48] sm:$0xff] }
 0x2e9   :  { %905 = vst.msk [vmem:[#allocation4 + $0x18] sm:$0xff] %vm2784_vm15, %v888_v15  ;;  %vm2802_vm15 = vmmov %vm2737_vm0 }
 0x2ea   :  { %v876_v3 = vpop.xlane.xlu0 %875 }
 0x2eb   :  { %v896_v8 = vadd.f32 %v876_v3, %v848_v56  ;;  %v874_v23 = vpop.xlane.xlu1 %873 }
 0x2ec   :  { %v1538_v17 = vpop.eup %1537  ;;  %v1129_v38 = vld [vmem:[#allocation4] sm:$0xff]  ;;  %v895_v9 = vadd.f32 %v874_v23, %v847_v5  ;;  %v836_v5 = vld [vmem:[#allocation4 + $0x78] sm:$0xff]  ;;  %v1214_v23 = vld [vmem:[#allocation6 + $0x28] sm:$0xff] }
 0x2ed   :  { %v1540_v37 = vpop.eup %1539  ;;  %v1148_v19 = vmul.f32 0.6931472, %v1538_v17  ;;  %1549 = vlog2.f32 %v1129_v38  ;;  %913 = vst.msk [vmem:[#allocation4 + $0x58] sm:$0xff] %vm2788_vm9, %v896_v8  ;;  %vm2803_vm9 = vmmov %vm2737_vm0 }
 0x2ee   :  { %v1542_v55 = vpop.eup %1541  ;;  %912 = vst.msk [vmem:[#allocation4 + $0x50] sm:$0xff] %vm2789_vm14, %v895_v9  ;;  %v858_v30 = vpop.xlane.xlu0 %857  ;;  %1551 = vrcp.f32 %v1209_v29  ;;  %v1228_v28 = vmul.f32 %v1540_v37, %v1194_v32  ;;  %vm2804_vm14 = vmmov %vm2737_vm0 }
 0x2ef   :  { %v1544_v40 = vpop.eup %1543  ;;  %v1178_v50 = vadd.f32 %v1148_v19, %v1114_v46  ;;  %v887_v44 = vadd.f32 %v858_v30, %v839_v13  ;;  %v862_v34 = vpop.xlane.xlu1 %861  ;;  %1553 = vpow2.f32 %v675_v39  ;;  %v842_v63 = vmul.f32 %v1542_v55, %v826_v10  ;;  %v1218_v19 = vld [vmem:[#allocation6 + $0x48] sm:$0xff] }
 0x2f0   :  { %v1132_v42 = vld [vmem:[#allocation4 + $0x18] sm:$0xff]  ;;  %v889_v62 = vadd.f32 %v862_v34, %v841_v45  ;;  %v1546_v14 = vpop.eup %1545  ;;  %v849_v21 = vmul.f32 %v1544_v40, %v833_v6  ;;  %v943_v46 = vld [vmem:[#allocation5 + $0x48] sm:$0xff] }
 0x2f1   :  { %v1258_v52 = vsub.f32 %v1228_v28, %v1178_v50  ;;  %1555 = vlog2.f32 %v1132_v42  ;;  %904 = vst.msk [vmem:[#allocation4 + $0x10] sm:$0xff] %vm2790_vm11, %v887_v44  ;;  %v850_v0 = vmul.f32 %v1546_v14, %v834_v25  ;;  %v1548_v26 = vpop.eup %1547  ;;  %v1220_v50 = vld [vmem:[#allocation6 + $0x58] sm:$0xff]  ;;  %v1195_v44 = vld [vmem:[#allocation5 + $0x10] sm:$0xff]  ;;  %vm2805_vm11 = vmmov %vm2737_vm0 }
 0x2f2   :  { %906 = vst.msk [vmem:[#allocation4 + $0x20] sm:$0xff] %vm2737_vm0, %v889_v62  ;;  %v864_v16 = vpop.xlane.xlu0 %863  ;;  %1557 = vrcp.f32 %v1212_v33  ;;  %v844_v18 = vmul.f32 %v1548_v26, %v828_v12  ;;  %v945_v6 = vld [vmem:[#allocation5 + $0x58] sm:$0xff]  ;;  %v1197_v62 = vld [vmem:[#allocation5 + $0x20] sm:$0xff]  ;;  %v1198_v26 = vld [vmem:[#allocation5 + $0x28] sm:$0xff] }
 0x2f3   :  { %v1274_v53 = vmul.f32 -1.0, %v1258_v52  ;;  %v890_v51 = vadd.f32 %v864_v16, %v842_v63  ;;  %v878_v47 = vpop.xlane.xlu1 %877  ;;  %1559 = vrcp.f32 %v1211_v20  ;;  %v1216_v42 = vld [vmem:[#allocation6 + $0x38] sm:$0xff]  ;;  %v1115_v16 = vld [vmem:[#allocation3 + $0x10] sm:$0xff] }
 0x2f4   :  { %v897_v58 = vadd.f32 %v878_v47, %v849_v21  ;;  %v1140_v36 = vld [vmem:[#allocation4 + $0x58] sm:$0xff] }
 0x2f5   :  { %1290 = vst.msk [vmem:[%s2616_s4 + $0x8] sm:$0xff] %vm2791_vm8, %v1274_v53  ;;  %v1117_v53 = vld [vmem:[#allocation3 + $0x20] sm:$0xff]  ;;  %vm2806_vm8 = vmmov %vm2737_vm0 }
 0x2f6   :  { %907 = vst.msk [vmem:[#allocation4 + $0x28] sm:$0xff] %vm2792_vm6, %v890_v51  ;;  %v880_v48 = vpop.xlane.xlu0 %879  ;;  %vm2807_vm6 = vmmov %vm2737_vm0 }
 0x2f7   :  { %914 = vst.msk [vmem:[#allocation4 + $0x60] sm:$0xff] %vm2793_vm3, %v897_v58  ;;  %v1550_v2 = vpop.eup %1549  ;;  %v898_v24 = vadd.f32 %v880_v48, %v850_v0  ;;  %v1222_v0 = vld [vmem:[#allocation6 + $0x68] sm:$0xff]  ;;  %vm2808_vm3 = vmmov %vm2737_vm0 }
 0x2f8   :  { %v1146_v60 = vmul.f32 0.6931472, %v1550_v2  ;;  %v1131_v35 = vld [vmem:[#allocation4 + $0x10] sm:$0xff]  ;;  %v1552_v15 = vpop.eup %1551 }
 0x2f9   :  { %1561 = vlog2.f32 %v1131_v35  ;;  %v1133_v43 = vld [vmem:[#allocation4 + $0x20] sm:$0xff]  ;;  %915 = vst.msk [vmem:[#allocation4 + $0x68] sm:$0xff] %vm2794_vm2, %v898_v24  ;;  %v1554_v57 = vpop.eup %1553  ;;  %v1226_v56 = vmul.f32 %v1552_v15, %v1193_v11  ;;  %v1118_v15 = vld [vmem:[#allocation3 + $0x28] sm:$0xff]  ;;  %vm2809_vm2 = vmmov %vm2737_vm0 }
 0x2fa   :  { %v1177_v1 = vadd.f32 %v1146_v60, %v1113_v31  ;;  %1563 = vlog2.f32 %v1133_v43  ;;  %v868_v3 = vpop.xlane.xlu0 %867  ;;  %v852_v39 = vmul.f32 %v1554_v57, %v836_v5  ;;  %v947_v60 = vld [vmem:[#allocation5 + $0x68] sm:$0xff] }
 0x2fb   :  { %v1556_v7 = vpop.eup %1555  ;;  %1565 = vrcp.f32 %v1213_v4  ;;  %v892_v8 = vadd.f32 %v868_v3, %v844_v18  ;;  %v1224_v3 = vld [vmem:[#allocation6 + $0x78] sm:$0xff] }
 0x2fc   :  { %1567 = vlog2.f32 %v1138_v49  ;;  %v1257_v27 = vsub.f32 %v1226_v56, %v1177_v1  ;;  %v1152_v17 = vmul.f32 0.6931472, %v1556_v7  ;;  %v1558_v61 = vpop.eup %1557 }
 0x2fd   :  { %v1134_v29 = vld [vmem:[#allocation4 + $0x28] sm:$0xff]  ;;  %909 = vst.msk [vmem:[#allocation4 + $0x38] sm:$0xff] %vm2795_vm7, %v892_v8  ;;  %v1232_v32 = vmul.f32 %v1558_v61, %v1196_v41  ;;  %v1560_v45 = vpop.eup %1559  ;;  %vm2812_vm7 = vmmov %vm2737_vm0 }
 0x2fe   :  { %1569 = vlog2.f32 %v1134_v29  ;;  %v1273_v38 = vmul.f32 -1.0, %v1257_v27  ;;  %v1180_v9 = vadd.f32 %v1152_v17, %v1116_v59  ;;  %v884_v37 = vpop.xlane.xlu0 %883  ;;  %v1230_v51 = vmul.f32 %v1560_v45, %v1195_v44  ;;  %v1122_v8 = vld [vmem:[#allocation3 + $0x48] sm:$0xff]  ;;  %v949_v17 = vld [vmem:[#allocation5 + $0x78] sm:$0xff] }
 0x2ff   :  { %1571 = vrcp.f32 %v1214_v23  ;;  %v900_v13 = vadd.f32 %v884_v37, %v852_v39 }
 0x300   :  { %1289 = vst.msk [vmem:[%s2616_s4] sm:$0xff] %vm2796_vm5, %v1273_v38  ;;  %v1260_v55 = vsub.f32 %v1232_v32, %v1180_v9  ;;  %1573 = vlog2.f32 %v1140_v36  ;;  %v1142_v30 = vld [vmem:[#allocation4 + $0x68] sm:$0xff]  ;;  %v1200_v9 = vld [vmem:[#allocation5 + $0x38] sm:$0xff]  ;;  %vm2813_vm5 = vmmov %vm2737_vm0 }
 0x301   :  { %917 = vst.msk [vmem:[#allocation4 + $0x78] sm:$0xff] %vm2797_vm4, %v900_v13  ;;  %1575 = vrcp.f32 %v1218_v19  ;;  %vm2814_vm4 = vmmov %vm2737_vm0 }
 0x302   :  { %v1276_v10 = vmul.f32 -1.0, %v1260_v55  ;;  %v985_v40 = vpop.xlane.xlu0 %984  ;;  %1577 = vlog2.f32 %v1142_v30  ;;  %v1124_v55 = vld [vmem:[#allocation3 + $0x58] sm:$0xff] }
 0x303   :  { %v1562_v28 = vpop.eup %1561  ;;  %v1007_v34 = vadd.f32 %v985_v40, %v943_v46 }
 0x304   :  { %v1564_v33 = vpop.eup %1563  ;;  %1292 = vst.msk [vmem:[%s2616_s4 + $0x18] sm:$0xff] %vm2798_vm12, %v1276_v10  ;;  %v1150_v52 = vmul.f32 0.6931472, %v1562_v28  ;;  %v1136_v63 = vld [vmem:[#allocation4 + $0x38] sm:$0xff]  ;;  %vm2815_vm12 = vmmov %vm2737_vm0 }
 0x305   :  { %v1566_v14 = vpop.eup %1565  ;;  %v1154_v21 = vmul.f32 0.6931472, %v1564_v33  ;;  %1579 = vlog2.f32 %v1136_v63  ;;  %1023 = vst.msk [vmem:[#allocation5 + $0x48] sm:$0xff] %vm2799_vm13, %v1007_v34  ;;  %v1120_v10 = vld [vmem:[#allocation3 + $0x38] sm:$0xff]  ;;  %vm2816_vm13 = vmmov %vm2737_vm0 }
 0x306   :  { %v1568_v25 = vpop.eup %1567  ;;  %1581 = vrcp.f32 %v1220_v50  ;;  %v1179_v47 = vadd.f32 %v1150_v52, %v1115_v16  ;;  %v989_v58 = vpop.xlane.xlu0 %988  ;;  %v1234_v48 = vmul.f32 %v1566_v14, %v1197_v62  ;;  %v1126_v52 = vld [vmem:[#allocation3 + $0x68] sm:$0xff] }
 0x307   :  { %1583 = vrcp.f32 %v1216_v42  ;;  %v1181_v12 = vadd.f32 %v1154_v21, %v1117_v53  ;;  %v1009_v2 = vadd.f32 %v989_v58, %v945_v6  ;;  %v1164_v31 = vmul.f32 0.6931472, %v1568_v25 }
 0x308   :  { %v1570_v20 = vpop.eup %1569  ;;  %v1259_v11 = vsub.f32 %v1230_v51, %v1179_v47  ;;  %v1144_v4 = vld [vmem:[#allocation4 + $0x78] sm:$0xff] }
 0x309   :  { %v1156_v24 = vmul.f32 0.6931472, %v1570_v20  ;;  %v1572_v35 = vpop.eup %1571  ;;  %v1261_v49 = vsub.f32 %v1234_v48, %v1181_v12  ;;  %1585 = vlog2.f32 %v1144_v4  ;;  %1025 = vst.msk [vmem:[#allocation5 + $0x58] sm:$0xff] %vm2800_vm10, %v1009_v2  ;;  %v1186_v61 = vadd.f32 %v1164_v31, %v1122_v8  ;;  %v1128_v20 = vld [vmem:[#allocation3 + $0x78] sm:$0xff]  ;;  %v1217_v8 = vld [vmem:[#allocation6 + $0x40] sm:$0xff]  ;;  %vm2817_vm10 = vmmov %vm2737_vm0 }
 0x30a   :  { %v1574_v43 = vpop.eup %1573  ;;  %1587 = vrcp.f32 %v1222_v0  ;;  %v1236_v18 = vmul.f32 %v1572_v35, %v1198_v26  ;;  %v1275_v57 = vmul.f32 -1.0, %v1259_v11  ;;  %v993_v1 = vpop.xlane.xlu0 %992  ;;  %v2811_v35 = vld [vmem:[#allocation29_spill] sm:$0xff] }
 0x30b   :  { %v1182_v56 = vadd.f32 %v1156_v24, %v1118_v15  ;;  %v1277_v5 = vmul.f32 -1.0, %v1261_v49  ;;  %v1011_v7 = vadd.f32 %v993_v1, %v947_v60  ;;  %v1576_v41 = vpop.eup %1575  ;;  %v1168_v29 = vmul.f32 0.6931472, %v1574_v43  ;;  %v2810_v24 = vld [vmem:[#allocation26_spill] sm:$0xff]  ;;  %v827_v43 = vld [vmem:[#allocation4 + $0x30] sm:$0xff] }
 0x30c   :  { %1291 = vst.msk [vmem:[%s2616_s4 + $0x10] sm:$0xff] %vm2801_vm1, %v1275_v57  ;;  %v1202_v27 = vld [vmem:[#allocation5 + $0x48] sm:$0xff]  ;;  %v1578_v36 = vpop.eup %1577  ;;  %1589 = vrcp.f32 %v1224_v3  ;;  %v635_v4 = vsub.f32 %v2810_v24, %v2143_v54  ;;  %v643_v15 = vsub.f32 %v2811_v35, %v2162_v22  ;;  %v835_v3 = vld [vmem:[#allocation4 + $0x70] sm:$0xff]  ;;  %v942_v22 = vld [vmem:[#allocation5 + $0x40] sm:$0xff] }
 0x30d   :  { %v1262_v23 = vsub.f32 %v1236_v18, %v1182_v56  ;;  %1293 = vst.msk [vmem:[%s2616_s4 + $0x20] sm:$0xff] %vm2802_vm15, %v1277_v5  ;;  %v1244_v59 = vmul.f32 %v1576_v41, %v1202_v27  ;;  %v1172_v40 = vmul.f32 0.6931472, %v1578_v36  ;;  %v1188_v50 = vadd.f32 %v1168_v29, %v1124_v55  ;;  %v1137_v18 = vld [vmem:[#allocation4 + $0x40] sm:$0xff]  ;;  %v1219_v29 = vld [vmem:[#allocation6 + $0x50] sm:$0xff]  ;;  %vm2818_vm1 = vmmov %vm2737_vm0 }
 0x30e   :  { %1027 = vst.msk [vmem:[#allocation5 + $0x68] sm:$0xff] %vm2803_vm9, %v1011_v7  ;;  %v997_v32 = vpop.xlane.xlu0 %996  ;;  %v657_v60 = vmul.f32 1.442695, %v635_v4  ;;  %v673_v31 = vmul.f32 1.442695, %v643_v15  ;;  %v1139_v7 = vld [vmem:[#allocation4 + $0x50] sm:$0xff]  ;;  %vm2819_vm15 = vmmov %vm2737_vm0 }
 0x30f   :  { %v1278_v39 = vmul.f32 -1.0, %v1262_v23  ;;  %v1580_v38 = vpop.eup %1579  ;;  %v1266_v37 = vsub.f32 %v1244_v59, %v1186_v61  ;;  %v1013_v19 = vadd.f32 %v997_v32, %v949_v17  ;;  %v1190_v25 = vadd.f32 %v1172_v40, %v1126_v52  ;;  %v1141_v27 = vld [vmem:[#allocation4 + $0x60] sm:$0xff]  ;;  %v1215_v59 = vld [vmem:[#allocation6 + $0x30] sm:$0xff]  ;;  %vm2820_vm9 = vmmov %vm2737_vm0 }
 0x310   :  { %v1582_v13 = vpop.eup %1581  ;;  %v1160_v46 = vmul.f32 0.6931472, %v1580_v38  ;;  %v1204_v30 = vld [vmem:[#allocation5 + $0x58] sm:$0xff]  ;;  %1591 = vpow2.f32 %v657_v60  ;;  %v1125_v60 = vld [vmem:[#allocation3 + $0x60] sm:$0xff] }
 0x311   :  { %1294 = vst.msk [vmem:[%s2616_s4 + $0x28] sm:$0xff] %vm2804_vm14, %v1278_v39  ;;  %v1584_v45 = vpop.eup %1583  ;;  %v1282_v28 = vmul.f32 -1.0, %v1266_v37  ;;  %v1248_v44 = vmul.f32 %v1582_v13, %v1204_v30  ;;  %1593 = vpow2.f32 %v673_v31  ;;  %v944_v39 = vld [vmem:[#allocation5 + $0x50] sm:$0xff]  ;;  %v946_v13 = vld [vmem:[#allocation5 + $0x60] sm:$0xff]  ;;  %vm2821_vm14 = vmmov %vm2737_vm0 }
 0x312   :  { %1029 = vst.msk [vmem:[#allocation5 + $0x78] sm:$0xff] %vm2805_vm11, %v1013_v19  ;;  %v1240_v34 = vmul.f32 %v1584_v45, %v1200_v9  ;;  %v1184_v6 = vadd.f32 %v1160_v46, %v1120_v10  ;;  %1595 = vlog2.f32 %v1137_v18  ;;  %v1221_v9 = vld [vmem:[#allocation6 + $0x60] sm:$0xff]  ;;  %v1223_v45 = vld [vmem:[#allocation6 + $0x70] sm:$0xff]  ;;  %vm2822_vm11 = vmmov %vm2737_vm0 }
 0x313   :  { %v1586_v33 = vpop.eup %1585  ;;  %1298 = vst.msk [vmem:[%s2616_s4 + $0x48] sm:$0xff] %vm2737_vm0, %v1282_v28  ;;  %v1268_v42 = vsub.f32 %v1248_v44, %v1188_v50  ;;  %1597 = vlog2.f32 %v1139_v7  ;;  %v1121_v28 = vld [vmem:[#allocation3 + $0x40] sm:$0xff]  ;;  %v948_v44 = vld [vmem:[#allocation5 + $0x70] sm:$0xff] }
 0x314   :  { %v1588_v62 = vpop.eup %1587  ;;  %v1264_v63 = vsub.f32 %v1240_v34, %v1184_v6  ;;  %v1176_v16 = vmul.f32 0.6931472, %v1586_v33  ;;  %1599 = vrcp.f32 %v1217_v8 }
 0x315   :  { %v1206_v14 = vld [vmem:[#allocation5 + $0x68] sm:$0xff]  ;;  %v1284_v21 = vmul.f32 -1.0, %v1268_v42  ;;  %1601 = vlog2.f32 %v1141_v27 }
 0x316   :  { %v1252_v53 = vmul.f32 %v1588_v62, %v1206_v14  ;;  %v1280_v51 = vmul.f32 -1.0, %v1264_v63  ;;  %v1590_v58 = vpop.eup %1589  ;;  %v1192_v48 = vadd.f32 %v1176_v16, %v1128_v20  ;;  %v1199_v63 = vld [vmem:[#allocation5 + $0x30] sm:$0xff] }
 0x317   :  { %1300 = vst.msk [vmem:[%s2616_s4 + $0x58] sm:$0xff] %vm2806_vm8, %v1284_v21 }
 0x318   :  { %v1270_v47 = vsub.f32 %v1252_v53, %v1190_v25  ;;  %1296 = vst.msk [vmem:[%s2616_s4 + $0x38] sm:$0xff] %vm2807_vm6, %v1280_v51  ;;  %v1123_v25 = vld [vmem:[#allocation3 + $0x50] sm:$0xff] }
 0x319   :  { %v1208_v0 = vld [vmem:[#allocation5 + $0x78] sm:$0xff] }
 0x31a   :  { %v1286_v26 = vmul.f32 -1.0, %v1270_v47  ;;  %v1256_v12 = vmul.f32 %v1590_v58, %v1208_v0  ;;  %v1592_v49 = vpop.eup %1591  ;;  %v1119_v58 = vld [vmem:[#allocation3 + $0x30] sm:$0xff] }
 0x31b   :  { %v843_v57 = vmul.f32 %v1592_v49, %v827_v43  ;;  %v1594_v56 = vpop.eup %1593 }
 0x31c   :  { %1302 = vst.msk [vmem:[%s2616_s4 + $0x68] sm:$0xff] %vm2808_vm3, %v1286_v26  ;;  %v1272_v2 = vsub.f32 %v1256_v12, %v1192_v48  ;;  %v851_v54 = vmul.f32 %v1594_v56, %v835_v3  ;;  %v1596_v32 = vpop.eup %1595  ;;  %v1127_v3 = vld [vmem:[#allocation3 + $0x70] sm:$0xff] }
 0x31d   :  { %v1162_v55 = vmul.f32 0.6931472, %v1596_v32  ;;  %v1598_v46 = vpop.eup %1597 }
 0x31e   :  { %v1288_v11 = vmul.f32 -1.0, %v1272_v2  ;;  %v1600_v40 = vpop.eup %1599  ;;  %v1166_v34 = vmul.f32 0.6931472, %v1598_v46 }
 0x31f   :  { %v1185_v6 = vadd.f32 %v1162_v55, %v1121_v28  ;;  %v1602_v42 = vpop.eup %1601 }
 0x320   :  { %1304 = vst.msk [vmem:[%s2616_s4 + $0x78] sm:$0xff] %vm2809_vm2, %v1288_v11  ;;  %v1170_v20 = vmul.f32 0.6931472, %v1602_v42  ;;  %v1187_v26 = vadd.f32 %v1166_v34, %v1123_v25 }
 0x322   :  { %v1189_v43 = vadd.f32 %v1170_v20, %v1125_v60 }
 0x348   :  { %v866_v1 = vpop.xlane.xlu1 %865 }
 0x349   :  { %v891_v5 = vadd.f32 %v866_v1, %v843_v57 }
 0x34b   :  { %908 = vst.msk [vmem:[#allocation4 + $0x30] sm:$0xff] %vm2812_vm7, %v891_v5 }
 0x34c   :  { %v882_v41 = vpop.xlane.xlu1 %881 }
 0x34d   :  { %v899_v23 = vadd.f32 %v882_v41, %v851_v54 }
 0x34f   :  { %916 = vst.msk [vmem:[#allocation4 + $0x70] sm:$0xff] %vm2813_vm5, %v899_v23 }
 0x350   :  { %v983_v17 = vpop.xlane.xlu1 %982 }
 0x351   :  { %v1006_v61 = vadd.f32 %v983_v17, %v942_v22 }
 0x352   :  { %v1135_v36 = vld [vmem:[#allocation4 + $0x30] sm:$0xff] }
 0x353   :  { %1603 = vlog2.f32 %v1135_v36  ;;  %1022 = vst.msk [vmem:[#allocation5 + $0x40] sm:$0xff] %vm2814_vm4, %v1006_v61 }
 0x354   :  { %1605 = vrcp.f32 %v1219_v29  ;;  %v987_v38 = vpop.xlane.xlu1 %986 }
 0x355   :  { %1607 = vrcp.f32 %v1215_v59  ;;  %v1008_v37 = vadd.f32 %v987_v38, %v944_v39 }
 0x356   :  { %v1143_v19 = vld [vmem:[#allocation4 + $0x70] sm:$0xff] }
 0x357   :  { %1609 = vlog2.f32 %v1143_v19  ;;  %1024 = vst.msk [vmem:[#allocation5 + $0x50] sm:$0xff] %vm2815_vm12, %v1008_v37 }
 0x358   :  { %1611 = vrcp.f32 %v1221_v9  ;;  %v991_v30 = vpop.xlane.xlu1 %990 }
 0x359   :  { %v1010_v10 = vadd.f32 %v991_v30, %v946_v13  ;;  %1613 = vrcp.f32 %v1223_v45 }
 0x35a   :  { %v1201_v50 = vld [vmem:[#allocation5 + $0x40] sm:$0xff] }
 0x35b   :  { %v1242_v33 = vmul.f32 %v1600_v40, %v1201_v50  ;;  %1026 = vst.msk [vmem:[#allocation5 + $0x60] sm:$0xff] %vm2816_vm13, %v1010_v10 }
 0x35c   :  { %v995_v62 = vpop.xlane.xlu1 %994 }
 0x35d   :  { %v1604_v52 = vpop.eup %1603  ;;  %v1265_v14 = vsub.f32 %v1242_v33, %v1185_v6  ;;  %v1012_v16 = vadd.f32 %v995_v62, %v948_v44 }
 0x35e   :  { %v1606_v21 = vpop.eup %1605  ;;  %v1158_v53 = vmul.f32 0.6931472, %v1604_v52  ;;  %v1203_v51 = vld [vmem:[#allocation5 + $0x50] sm:$0xff] }
 0x35f   :  { %v1608_v47 = vpop.eup %1607  ;;  %v1281_v0 = vmul.f32 -1.0, %v1265_v14  ;;  %v1246_v48 = vmul.f32 %v1606_v21, %v1203_v51  ;;  %1028 = vst.msk [vmem:[#allocation5 + $0x70] sm:$0xff] %vm2817_vm10, %v1012_v16 }
 0x360   :  { %v1238_v12 = vmul.f32 %v1608_v47, %v1199_v63  ;;  %v1183_v2 = vadd.f32 %v1158_v53, %v1119_v58 }
 0x361   :  { %v1610_v11 = vpop.eup %1609  ;;  %1297 = vst.msk [vmem:[%s2616_s4 + $0x40] sm:$0xff] %vm2818_vm1, %v1281_v0  ;;  %v1267_v24 = vsub.f32 %v1246_v48, %v1187_v26 }
 0x362   :  { %v1612_v4 = vpop.eup %1611  ;;  %v1263_v35 = vsub.f32 %v1238_v12, %v1183_v2  ;;  %v1205_v15 = vld [vmem:[#allocation5 + $0x60] sm:$0xff]  ;;  %v1174_v31 = vmul.f32 0.6931472, %v1610_v11 }
 0x363   :  { %v1283_v49 = vmul.f32 -1.0, %v1267_v24  ;;  %v1250_v18 = vmul.f32 %v1612_v4, %v1205_v15  ;;  %v1614_v1 = vpop.eup %1613 }
 0x364   :  { %v1279_v57 = vmul.f32 -1.0, %v1263_v35  ;;  %v1191_v54 = vadd.f32 %v1174_v31, %v1127_v3 }
 0x365   :  { %1299 = vst.msk [vmem:[%s2616_s4 + $0x50] sm:$0xff] %vm2819_vm15, %v1283_v49  ;;  %v1269_v56 = vsub.f32 %v1250_v18, %v1189_v43 }
 0x366   :  { %1295 = vst.msk [vmem:[%s2616_s4 + $0x30] sm:$0xff] %vm2820_vm9, %v1279_v57  ;;  %v1207_v5 = vld [vmem:[#allocation5 + $0x70] sm:$0xff] }
 0x367   :  { %v1285_v7 = vmul.f32 -1.0, %v1269_v56  ;;  %v1254_v41 = vmul.f32 %v1614_v1, %v1207_v5 }
 0x369   :  { %1301 = vst.msk [vmem:[%s2616_s4 + $0x60] sm:$0xff] %vm2821_vm14, %v1285_v7  ;;  %v1271_v8 = vsub.f32 %v1254_v41, %v1191_v54 }
 0x36b   :  { %v1287_v23 = vmul.f32 -1.0, %v1271_v8 }
 0x36d   :  { %1303 = vst.msk [vmem:[%s2616_s4 + $0x70] sm:$0xff] %vm2822_vm11, %v1287_v23 }
 0x36e   :  { %1309 = vsyncpa [#allocation8], 1 }

</bundles_post_ra>
